<compile_context>
chip_gen: v7x
topology: tpu7x:2x2x1
jax: 0.10.0
libtpu: 0.0.40
codegen_flags: <defaults>
</compile_context>

<pallas_src>
import jax
import jax.numpy as jnp
from jax.experimental import pallas as pl
from jax.experimental.pallas import tpu as pltpu

EPS = 1e-5
LANE = 128


def _round_up(x, m):
    return (x + m - 1) // m * m


def _pad_axis(a, axis, target):
    pad = target - a.shape[axis]
    if pad == 0:
        return a
    widths = [(0, 0)] * a.ndim
    widths[axis] = (0, pad)
    return jnp.pad(a, widths)


# ------------------------------ fused kernel -------------------------------- #

def _make_bottleneck_kernel(H, W, Pp):
    HW = H * W

    def kernel(x_ref, w1_ref, s1_ref, b1_ref, w2_ref, s2_ref, b2_ref,
               w3_ref, s3_ref, b3_ref, o_ref, h1pad_ref, acc_ref):
        x = x_ref[0]                                        # (HW, Cin_p) bf16

        # ---- conv1 (1x1) + bn1 + relu (f32 epilogue) ----
        h1 = jnp.dot(x, w1_ref[...], preferred_element_type=jnp.float32)
        h1 = jnp.maximum(h1 * s1_ref[...] + b1_ref[...], 0.0)

        # ---- conv2 (3x3, pad=1, stride=1) as 9 shifted matmuls ----
        # Zero halo in the (H+2, W+2, Pp) scratch == the conv's zero padding,
        # so each (kh, kw) tap is a contiguous (HW, Pp) x (Pp, Pp) matmul.
        h1pad_ref[...] = jnp.zeros_like(h1pad_ref)
        h1pad_ref[pl.ds(1, H), pl.ds(1, W), :] = h1.reshape(H, W, Pp)

        acc_ref[...] = jnp.zeros_like(acc_ref)
        for kh in range(3):
            for kw in range(3):
                win = h1pad_ref[pl.ds(kh, H), pl.ds(kw, W), :]
                acc_ref[...] += jnp.dot(
                    win.reshape(HW, Pp).astype(w2_ref.dtype),
                    w2_ref[kh * 3 + kw],
                    preferred_element_type=jnp.float32)
        h2 = jnp.maximum(acc_ref[...] * s2_ref[...] + b2_ref[...], 0.0)

        # ---- conv3 (1x1) + bn3 + identity residual + relu ----
        y = jnp.dot(h2.astype(w3_ref.dtype), w3_ref[...],
                    preferred_element_type=jnp.float32)
        y = y * s3_ref[...] + b3_ref[...] + x.astype(jnp.float32)
        o_ref[0] = jnp.maximum(y, 0.0).astype(o_ref.dtype)

    return kernel


# ------------------------------- JAX wrapper -------------------------------- #

def _fold_bn(bn, cpad):
    gamma, beta, mean, var = bn
    scale = gamma / jnp.sqrt(var + EPS)
    bias = beta - mean * scale
    scale = _pad_axis(scale.reshape(1, -1), 1, cpad).astype(jnp.float32)
    bias = _pad_axis(bias.reshape(1, -1), 1, cpad).astype(jnp.float32)
    return scale, bias


def bottleneck_forward(x_nchw, params, stride=1):
    """Forward of Bottleneck_old (downsample=None). Input/output are NCHW."""
    if stride != 1:
        # TODO(synk): stride != 1 needs a downsample branch on the residual.
        raise NotImplementedError("fused kernel covers stride=1 / downsample=None")

    N, Cin, H, W = x_nchw.shape
    planes = params["w1"].shape[0]
    Cout = 4 * planes
    assert Cin == Cout, "identity residual requires inplanes == 4 * planes"
    assert W % 8 == 0, "W must be a multiple of 8 (layout-compatible reshapes)"

    Cin_p = _round_up(Cin, LANE)
    Pp = _round_up(planes, LANE)
    Cout_p = _round_up(Cout, LANE)          # == Cin_p since Cin == Cout
    HW = H * W
    cdt = jnp.bfloat16                      # MXU input dtype; accumulate in f32

    # Activations: NCHW -> (N, H*W, Cin_p), zero channel padding, bf16.
    # (NCHW interface kept to match the PyTorch module; a NHWC caller could
    # skip these transposes entirely.)
    x = jnp.transpose(x_nchw, (0, 2, 3, 1)).reshape(N, HW, Cin)
    x = _pad_axis(x, 2, Cin_p).astype(cdt)

    # Weights folded to matmul form, zero-padded to 128-lane multiples.
    w1 = params["w1"][:, :, 0, 0].T                              # (Cin, planes)
    w1 = _pad_axis(_pad_axis(w1, 0, Cin_p), 1, Pp).astype(cdt)
    w2 = jnp.transpose(params["w2"], (2, 3, 1, 0)).reshape(9, planes, planes)
    w2 = _pad_axis(_pad_axis(w2, 1, Pp), 2, Pp).astype(cdt)      # (9, Pp, Pp)
    w3 = params["w3"][:, :, 0, 0].T                              # (planes, 4p)
    w3 = _pad_axis(_pad_axis(w3, 0, Pp), 1, Cout_p).astype(cdt)

    s1, b1 = _fold_bn(params["bn1"], Pp)
    s2, b2 = _fold_bn(params["bn2"], Pp)
    s3, b3 = _fold_bn(params["bn3"], Cout_p)

    kernel = _make_bottleneck_kernel(H, W, Pp)

    out = pl.pallas_call(
        kernel,
        out_shape=jax.ShapeDtypeStruct((N, HW, Cout_p), jnp.float32),
        grid=(N,),
        in_specs=[
            pl.BlockSpec((1, HW, Cin_p), lambda n: (n, 0, 0)),   # x (also residual)
            pl.BlockSpec((Cin_p, Pp), lambda n: (0, 0)),         # w1
            pl.BlockSpec((1, Pp), lambda n: (0, 0)),             # s1
            pl.BlockSpec((1, Pp), lambda n: (0, 0)),             # b1
            pl.BlockSpec((9, Pp, Pp), lambda n: (0, 0, 0)),      # w2 taps
            pl.BlockSpec((1, Pp), lambda n: (0, 0)),             # s2
            pl.BlockSpec((1, Pp), lambda n: (0, 0)),             # b2
            pl.BlockSpec((Pp, Cout_p), lambda n: (0, 0)),        # w3
            pl.BlockSpec((1, Cout_p), lambda n: (0, 0)),         # s3
            pl.BlockSpec((1, Cout_p), lambda n: (0, 0)),         # b3
        ],
        out_specs=pl.BlockSpec((1, HW, Cout_p), lambda n: (n, 0, 0)),
        scratch_shapes=[
            pltpu.VMEM((H + 2, W + 2, Pp), jnp.float32),         # zero-padded h1
            pltpu.VMEM((HW, Pp), jnp.float32),                   # conv2 accumulator
        ],
        compiler_params=pltpu.CompilerParams(
            dimension_semantics=("parallel",),
            vmem_limit_bytes=32 * 1024 * 1024),
    )(x, w1, s1, b1, w2, s2, b2, w3, s3, b3)

    out = out[:, :, :Cout].reshape(N, H, W, Cout)
    return jnp.transpose(out, (0, 3, 1, 2))                      # back to NCHW


# --------------------------- deterministic params --------------------------- #

def init_params(key, inplanes, planes):
    ks = jax.random.split(key, 15)

    def conv_w(k, shape):  # (Cout, Cin, kH, kW), Kaiming-ish scale
        fan_in = shape[1] * shape[2] * shape[3]
        return jax.random.normal(k, shape, jnp.float32) * (2.0 / fan_in) ** 0.5

    def bn(k4, c):
        k0, k1, k2, k3 = k4
        gamma = jax.random.uniform(k0, (c,), jnp.float32, 0.5, 1.5)
        beta = jax.random.normal(k1, (c,), jnp.float32) * 0.1
        mean = jax.random.normal(k2, (c,), jnp.float32) * 0.1
        var = jax.random.uniform(k3, (c,), jnp.float32, 0.5, 1.5)
        return (gamma, beta, mean, var)

    return {
        "w1": conv_w(ks[0], (planes, inplanes, 1, 1)),
        "w2": conv_w(ks[1], (planes, planes, 3, 3)),
        "w3": conv_w(ks[2], (planes * 4, planes, 1, 1)),
        "bn1": bn(ks[3:7], planes),
        "bn2": bn(ks[7:11], planes),
        "bn3": bn(ks[11:15], planes * 4),
    }


# ------------------------------- reference --------------------------------- #

def reference_forward(x, params, stride=1):
    def conv(x, w, s=1, p=0):
        return jax.lax.conv_general_dilated(
            x, w, (s, s), [(p, p), (p, p)],
            dimension_numbers=("NCHW", "OIHW", "NCHW"))

    def bn(x, bnp):
        g, b, m, v = bnp
        sc = g / jnp.sqrt(v + EPS)
        return x * sc[None, :, None, None] + (b - m * sc)[None, :, None, None]

    out = jax.nn.relu(bn(conv(x, params["w1"]), params["bn1"]))
    out = jax.nn.relu(bn(conv(out, params["w2"], stride, 1), params["bn2"]))
    out = bn(conv(out, params["w3"]), params["bn3"])
    return jax.nn.relu(out + x)


# ---------------------------------- main ------------------------------------ #

if __name__ == "__main__":
    key = jax.random.PRNGKey(0)
    kx, kp = jax.random.split(key)

    planes = 8
    inplanes = planes * 4        # identity residual requires inplanes == planes*4
    N, H, W = 2, 16, 16

    x = jax.random.normal(kx, (N, inplanes, H, W), jnp.float32)
    params = init_params(kp, inplanes, planes)

    out = jax.jit(bottleneck_forward)(x, params)
    out = jax.block_until_ready(out)

    ref = jax.block_until_ready(reference_forward(x, params, stride=1))

    assert out.shape == (N, planes * 4, H, W), out.shape
    abs_err = float(jnp.max(jnp.abs(out - ref)))
    scale = float(jnp.max(jnp.abs(ref)))
    # bf16 MXU inputs with f32 accumulation/epilogue vs a pure-f32 reference.
    tol = 2e-2 * (scale + 1.0)
    assert abs_err < tol, f"error too large: abs={abs_err} (scale={scale}, tol={tol})"

    print("KERNEL_OK")
</pallas_src>

<mosaic_0001>
module attributes {stable_mosaic.version = 11 : i64} {
  func.func @kernel(%arg0: i32, %arg1: memref<1x256x128xbf16, #tpu.memory_space<vmem>>, %arg2: memref<128x128xbf16, #tpu.memory_space<vmem>>, %arg3: memref<1x128xf32, #tpu.memory_space<vmem>>, %arg4: memref<1x128xf32, #tpu.memory_space<vmem>>, %arg5: memref<9x128x128xbf16, #tpu.memory_space<vmem>>, %arg6: memref<1x128xf32, #tpu.memory_space<vmem>>, %arg7: memref<1x128xf32, #tpu.memory_space<vmem>>, %arg8: memref<128x128xbf16, #tpu.memory_space<vmem>>, %arg9: memref<1x128xf32, #tpu.memory_space<vmem>>, %arg10: memref<1x128xf32, #tpu.memory_space<vmem>>, %arg11: memref<1x256x128xf32, #tpu.memory_space<vmem>>, %arg12: memref<18x18x128xf32, #tpu.memory_space<vmem>>, %arg13: memref<256x128xf32, #tpu.memory_space<vmem>>) attributes {dimension_semantics = [#tpu.dimension_semantics<parallel>], iteration_bounds = array<i64: 2>, scalar_prefetch = 0 : i64, scratch_operands = 2 : i64, tpu.core_type = #tpu.core_type<tc>, window_params = [{transform_indices = @transform_0, window_bounds = array<i64: 1, 256, 128>}, {pipeline_mode = #tpu.pipeline_mode<synchronous>, transform_indices = @transform_1, window_bounds = array<i64: 128, 128>}, {pipeline_mode = #tpu.pipeline_mode<synchronous>, transform_indices = @transform_2, window_bounds = array<i64: 1, 128>}, {pipeline_mode = #tpu.pipeline_mode<synchronous>, transform_indices = @transform_3, window_bounds = array<i64: 1, 128>}, {pipeline_mode = #tpu.pipeline_mode<synchronous>, transform_indices = @transform_4, window_bounds = array<i64: 9, 128, 128>}, {pipeline_mode = #tpu.pipeline_mode<synchronous>, transform_indices = @transform_5, window_bounds = array<i64: 1, 128>}, {pipeline_mode = #tpu.pipeline_mode<synchronous>, transform_indices = @transform_6, window_bounds = array<i64: 1, 128>}, {pipeline_mode = #tpu.pipeline_mode<synchronous>, transform_indices = @transform_7, window_bounds = array<i64: 128, 128>}, {pipeline_mode = #tpu.pipeline_mode<synchronous>, transform_indices = @transform_8, window_bounds = array<i64: 1, 128>}, {pipeline_mode = #tpu.pipeline_mode<synchronous>, transform_indices = @transform_9, window_bounds = array<i64: 1, 128>}, {transform_indices = @transform_10, window_bounds = array<i64: 1, 256, 128>}]} {
    %c0 = arith.constant 0 : index
    %c0_0 = arith.constant 0 : index
    %c0_1 = arith.constant 0 : index
    %0 = vector.load %arg1[%c0, %c0_0, %c0_1] : memref<1x256x128xbf16, #tpu.memory_space<vmem>>, vector<1x256x128xbf16>
    %1 = vector.shape_cast %0 : vector<1x256x128xbf16> to vector<256x128xbf16>
    %c0_2 = arith.constant 0 : index
    %c0_3 = arith.constant 0 : index
    %2 = vector.load %arg2[%c0_2, %c0_3] : memref<128x128xbf16, #tpu.memory_space<vmem>>, vector<128x128xbf16>
    %cst = arith.constant dense<0.000000e+00> : vector<256x128xf32>
    %3 = tpu.matmul %1, %2, %cst {dimension_numbers = #tpu.dot_dimension_numbers<[1], [0], [0], [1], [0, 0, 1, 1], [], []>} : vector<256x128xbf16>, vector<128x128xbf16>, vector<256x128xf32> -> vector<256x128xf32>
    %c0_4 = arith.constant 0 : index
    %c0_5 = arith.constant 0 : index
    %4 = vector.load %arg3[%c0_4, %c0_5] : memref<1x128xf32, #tpu.memory_space<vmem>>, vector<1x128xf32>
    %5 = vector.broadcast %4 : vector<1x128xf32> to vector<256x128xf32>
    %6 = arith.mulf %3, %5 : vector<256x128xf32>
    %c0_6 = arith.constant 0 : index
    %c0_7 = arith.constant 0 : index
    %7 = vector.load %arg4[%c0_6, %c0_7] : memref<1x128xf32, #tpu.memory_space<vmem>>, vector<1x128xf32>
    %8 = vector.broadcast %7 : vector<1x128xf32> to vector<256x128xf32>
    %9 = arith.addf %6, %8 : vector<256x128xf32>
    %cst_8 = arith.constant 0.000000e+00 : f32
    %10 = vector.broadcast %cst_8 : f32 to vector<256x128xf32>
    %11 = arith.maximumf %9, %10 : vector<256x128xf32>
    %cst_9 = arith.constant 0.000000e+00 : f32
    %12 = vector.broadcast %cst_9 : f32 to vector<18x18x128xf32>
    %c0_10 = arith.constant 0 : index
    %c0_11 = arith.constant 0 : index
    %c0_12 = arith.constant 0 : index
    %13 = vector.load %arg12[%c0_10, %c0_11, %c0_12] : memref<18x18x128xf32, #tpu.memory_space<vmem>>, vector<18x18x128xf32>
    tpu.vector_store %arg12[%c0_10, %c0_11, %c0_12], %12 {strides = array<i32>} : memref<18x18x128xf32, #tpu.memory_space<vmem>>, vector<18x18x128xf32>,
    %14 = vector.shape_cast %11 : vector<256x128xf32> to vector<16x16x128xf32>
    %c1 = arith.constant 1 : index
    %c1_13 = arith.constant 1 : index
    %c0_14 = arith.constant 0 : index
    %15 = vector.load %arg12[%c1, %c1_13, %c0_14] : memref<18x18x128xf32, #tpu.memory_space<vmem>>, vector<16x16x128xf32>
    tpu.vector_store %arg12[%c1, %c1_13, %c0_14], %14 {strides = array<i32>} : memref<18x18x128xf32, #tpu.memory_space<vmem>>, vector<16x16x128xf32>,
    %cst_15 = arith.constant 0.000000e+00 : f32
    %16 = vector.broadcast %cst_15 : f32 to vector<256x128xf32>
    %c0_16 = arith.constant 0 : index
    %c0_17 = arith.constant 0 : index
    %17 = vector.load %arg13[%c0_16, %c0_17] : memref<256x128xf32, #tpu.memory_space<vmem>>, vector<256x128xf32>
    tpu.vector_store %arg13[%c0_16, %c0_17], %16 {strides = array<i32>} : memref<256x128xf32, #tpu.memory_space<vmem>>, vector<256x128xf32>,
    %c0_18 = arith.constant 0 : index
    %c0_19 = arith.constant 0 : index
    %c0_20 = arith.constant 0 : index
    %18 = vector.load %arg12[%c0_18, %c0_19, %c0_20] : memref<18x18x128xf32, #tpu.memory_space<vmem>>, vector<16x16x128xf32>
    %c0_21 = arith.constant 0 : index
    %c0_22 = arith.constant 0 : index
    %19 = vector.load %arg13[%c0_21, %c0_22] : memref<256x128xf32, #tpu.memory_space<vmem>>, vector<256x128xf32>
    %20 = vector.shape_cast %18 : vector<16x16x128xf32> to vector<256x128xf32>
    %21 = arith.truncf %20 : vector<256x128xf32> to vector<256x128xbf16>
    %c0_23 = arith.constant 0 : index
    %c0_24 = arith.constant 0 : index
    %c0_25 = arith.constant 0 : index
    %22 = vector.load %arg5[%c0_23, %c0_24, %c0_25] : memref<9x128x128xbf16, #tpu.memory_space<vmem>>, vector<1x128x128xbf16>
    %23 = vector.shape_cast %22 : vector<1x128x128xbf16> to vector<128x128xbf16>
    %cst_26 = arith.constant dense<0.000000e+00> : vector<256x128xf32>
    %24 = tpu.matmul %21, %23, %cst_26 {dimension_numbers = #tpu.dot_dimension_numbers<[1], [0], [0], [1], [0, 0, 1, 1], [], []>} : vector<256x128xbf16>, vector<128x128xbf16>, vector<256x128xf32> -> vector<256x128xf32>
    %25 = arith.addf %19, %24 : vector<256x128xf32>
    %c0_27 = arith.constant 0 : index
    %c0_28 = arith.constant 0 : index
    %26 = vector.load %arg13[%c0_27, %c0_28] : memref<256x128xf32, #tpu.memory_space<vmem>>, vector<256x128xf32>
    tpu.vector_store %arg13[%c0_27, %c0_28], %25 {strides = array<i32>} : memref<256x128xf32, #tpu.memory_space<vmem>>, vector<256x128xf32>,
    %c0_29 = arith.constant 0 : index
    %c1_30 = arith.constant 1 : index
    %c0_31 = arith.constant 0 : index
    %27 = vector.load %arg12[%c0_29, %c1_30, %c0_31] : memref<18x18x128xf32, #tpu.memory_space<vmem>>, vector<16x16x128xf32>
    %c0_32 = arith.constant 0 : index
    %c0_33 = arith.constant 0 : index
    %28 = vector.load %arg13[%c0_32, %c0_33] : memref<256x128xf32, #tpu.memory_space<vmem>>, vector<256x128xf32>
    %29 = vector.shape_cast %27 : vector<16x16x128xf32> to vector<256x128xf32>
    %30 = arith.truncf %29 : vector<256x128xf32> to vector<256x128xbf16>
    %c1_34 = arith.constant 1 : index
    %c0_35 = arith.constant 0 : index
    %c0_36 = arith.constant 0 : index
    %31 = vector.load %arg5[%c1_34, %c0_35, %c0_36] : memref<9x128x128xbf16, #tpu.memory_space<vmem>>, vector<1x128x128xbf16>
    %32 = vector.shape_cast %31 : vector<1x128x128xbf16> to vector<128x128xbf16>
    %cst_37 = arith.constant dense<0.000000e+00> : vector<256x128xf32>
    %33 = tpu.matmul %30, %32, %cst_37 {dimension_numbers = #tpu.dot_dimension_numbers<[1], [0], [0], [1], [0, 0, 1, 1], [], []>} : vector<256x128xbf16>, vector<128x128xbf16>, vector<256x128xf32> -> vector<256x128xf32>
    %34 = arith.addf %28, %33 : vector<256x128xf32>
    %c0_38 = arith.constant 0 : index
    %c0_39 = arith.constant 0 : index
    %35 = vector.load %arg13[%c0_38, %c0_39] : memref<256x128xf32, #tpu.memory_space<vmem>>, vector<256x128xf32>
    tpu.vector_store %arg13[%c0_38, %c0_39], %34 {strides = array<i32>} : memref<256x128xf32, #tpu.memory_space<vmem>>, vector<256x128xf32>,
    %c0_40 = arith.constant 0 : index
    %c2 = arith.constant 2 : index
    %c0_41 = arith.constant 0 : index
    %36 = vector.load %arg12[%c0_40, %c2, %c0_41] : memref<18x18x128xf32, #tpu.memory_space<vmem>>, vector<16x16x128xf32>
    %c0_42 = arith.constant 0 : index
    %c0_43 = arith.constant 0 : index
    %37 = vector.load %arg13[%c0_42, %c0_43] : memref<256x128xf32, #tpu.memory_space<vmem>>, vector<256x128xf32>
    %38 = vector.shape_cast %36 : vector<16x16x128xf32> to vector<256x128xf32>
    %39 = arith.truncf %38 : vector<256x128xf32> to vector<256x128xbf16>
    %c2_44 = arith.constant 2 : index
    %c0_45 = arith.constant 0 : index
    %c0_46 = arith.constant 0 : index
    %40 = vector.load %arg5[%c2_44, %c0_45, %c0_46] : memref<9x128x128xbf16, #tpu.memory_space<vmem>>, vector<1x128x128xbf16>
    %41 = vector.shape_cast %40 : vector<1x128x128xbf16> to vector<128x128xbf16>
    %cst_47 = arith.constant dense<0.000000e+00> : vector<256x128xf32>
    %42 = tpu.matmul %39, %41, %cst_47 {dimension_numbers = #tpu.dot_dimension_numbers<[1], [0], [0], [1], [0, 0, 1, 1], [], []>} : vector<256x128xbf16>, vector<128x128xbf16>, vector<256x128xf32> -> vector<256x128xf32>
    %43 = arith.addf %37, %42 : vector<256x128xf32>
    %c0_48 = arith.constant 0 : index
    %c0_49 = arith.constant 0 : index
    %44 = vector.load %arg13[%c0_48, %c0_49] : memref<256x128xf32, #tpu.memory_space<vmem>>, vector<256x128xf32>
    tpu.vector_store %arg13[%c0_48, %c0_49], %43 {strides = array<i32>} : memref<256x128xf32, #tpu.memory_space<vmem>>, vector<256x128xf32>,
    %c1_50 = arith.constant 1 : index
    %c0_51 = arith.constant 0 : index
    %c0_52 = arith.constant 0 : index
    %45 = vector.load %arg12[%c1_50, %c0_51, %c0_52] : memref<18x18x128xf32, #tpu.memory_space<vmem>>, vector<16x16x128xf32>
    %c0_53 = arith.constant 0 : index
    %c0_54 = arith.constant 0 : index
    %46 = vector.load %arg13[%c0_53, %c0_54] : memref<256x128xf32, #tpu.memory_space<vmem>>, vector<256x128xf32>
    %47 = vector.shape_cast %45 : vector<16x16x128xf32> to vector<256x128xf32>
    %48 = arith.truncf %47 : vector<256x128xf32> to vector<256x128xbf16>
    %c3 = arith.constant 3 : index
    %c0_55 = arith.constant 0 : index
    %c0_56 = arith.constant 0 : index
    %49 = vector.load %arg5[%c3, %c0_55, %c0_56] : memref<9x128x128xbf16, #tpu.memory_space<vmem>>, vector<1x128x128xbf16>
    %50 = vector.shape_cast %49 : vector<1x128x128xbf16> to vector<128x128xbf16>
    %cst_57 = arith.constant dense<0.000000e+00> : vector<256x128xf32>
    %51 = tpu.matmul %48, %50, %cst_57 {dimension_numbers = #tpu.dot_dimension_numbers<[1], [0], [0], [1], [0, 0, 1, 1], [], []>} : vector<256x128xbf16>, vector<128x128xbf16>, vector<256x128xf32> -> vector<256x128xf32>
    %52 = arith.addf %46, %51 : vector<256x128xf32>
    %c0_58 = arith.constant 0 : index
    %c0_59 = arith.constant 0 : index
    %53 = vector.load %arg13[%c0_58, %c0_59] : memref<256x128xf32, #tpu.memory_space<vmem>>, vector<256x128xf32>
    tpu.vector_store %arg13[%c0_58, %c0_59], %52 {strides = array<i32>} : memref<256x128xf32, #tpu.memory_space<vmem>>, vector<256x128xf32>,
    %c1_60 = arith.constant 1 : index
    %c1_61 = arith.constant 1 : index
    %c0_62 = arith.constant 0 : index
    %54 = vector.load %arg12[%c1_60, %c1_61, %c0_62] : memref<18x18x128xf32, #tpu.memory_space<vmem>>, vector<16x16x128xf32>
    %c0_63 = arith.constant 0 : index
    %c0_64 = arith.constant 0 : index
    %55 = vector.load %arg13[%c0_63, %c0_64] : memref<256x128xf32, #tpu.memory_space<vmem>>, vector<256x128xf32>
    %56 = vector.shape_cast %54 : vector<16x16x128xf32> to vector<256x128xf32>
    %57 = arith.truncf %56 : vector<256x128xf32> to vector<256x128xbf16>
    %c4 = arith.constant 4 : index
    %c0_65 = arith.constant 0 : index
    %c0_66 = arith.constant 0 : index
    %58 = vector.load %arg5[%c4, %c0_65, %c0_66] : memref<9x128x128xbf16, #tpu.memory_space<vmem>>, vector<1x128x128xbf16>
    %59 = vector.shape_cast %58 : vector<1x128x128xbf16> to vector<128x128xbf16>
    %cst_67 = arith.constant dense<0.000000e+00> : vector<256x128xf32>
    %60 = tpu.matmul %57, %59, %cst_67 {dimension_numbers = #tpu.dot_dimension_numbers<[1], [0], [0], [1], [0, 0, 1, 1], [], []>} : vector<256x128xbf16>, vector<128x128xbf16>, vector<256x128xf32> -> vector<256x128xf32>
    %61 = arith.addf %55, %60 : vector<256x128xf32>
    %c0_68 = arith.constant 0 : index
    %c0_69 = arith.constant 0 : index
    %62 = vector.load %arg13[%c0_68, %c0_69] : memref<256x128xf32, #tpu.memory_space<vmem>>, vector<256x128xf32>
    tpu.vector_store %arg13[%c0_68, %c0_69], %61 {strides = array<i32>} : memref<256x128xf32, #tpu.memory_space<vmem>>, vector<256x128xf32>,
    %c1_70 = arith.constant 1 : index
    %c2_71 = arith.constant 2 : index
    %c0_72 = arith.constant 0 : index
    %63 = vector.load %arg12[%c1_70, %c2_71, %c0_72] : memref<18x18x128xf32, #tpu.memory_space<vmem>>, vector<16x16x128xf32>
    %c0_73 = arith.constant 0 : index
    %c0_74 = arith.constant 0 : index
    %64 = vector.load %arg13[%c0_73, %c0_74] : memref<256x128xf32, #tpu.memory_space<vmem>>, vector<256x128xf32>
    %65 = vector.shape_cast %63 : vector<16x16x128xf32> to vector<256x128xf32>
    %66 = arith.truncf %65 : vector<256x128xf32> to vector<256x128xbf16>
    %c5 = arith.constant 5 : index
    %c0_75 = arith.constant 0 : index
    %c0_76 = arith.constant 0 : index
    %67 = vector.load %arg5[%c5, %c0_75, %c0_76] : memref<9x128x128xbf16, #tpu.memory_space<vmem>>, vector<1x128x128xbf16>
    %68 = vector.shape_cast %67 : vector<1x128x128xbf16> to vector<128x128xbf16>
    %cst_77 = arith.constant dense<0.000000e+00> : vector<256x128xf32>
    %69 = tpu.matmul %66, %68, %cst_77 {dimension_numbers = #tpu.dot_dimension_numbers<[1], [0], [0], [1], [0, 0, 1, 1], [], []>} : vector<256x128xbf16>, vector<128x128xbf16>, vector<256x128xf32> -> vector<256x128xf32>
    %70 = arith.addf %64, %69 : vector<256x128xf32>
    %c0_78 = arith.constant 0 : index
    %c0_79 = arith.constant 0 : index
    %71 = vector.load %arg13[%c0_78, %c0_79] : memref<256x128xf32, #tpu.memory_space<vmem>>, vector<256x128xf32>
    tpu.vector_store %arg13[%c0_78, %c0_79], %70 {strides = array<i32>} : memref<256x128xf32, #tpu.memory_space<vmem>>, vector<256x128xf32>,
    %c2_80 = arith.constant 2 : index
    %c0_81 = arith.constant 0 : index
    %c0_82 = arith.constant 0 : index
    %72 = vector.load %arg12[%c2_80, %c0_81, %c0_82] : memref<18x18x128xf32, #tpu.memory_space<vmem>>, vector<16x16x128xf32>
    %c0_83 = arith.constant 0 : index
    %c0_84 = arith.constant 0 : index
    %73 = vector.load %arg13[%c0_83, %c0_84] : memref<256x128xf32, #tpu.memory_space<vmem>>, vector<256x128xf32>
    %74 = vector.shape_cast %72 : vector<16x16x128xf32> to vector<256x128xf32>
    %75 = arith.truncf %74 : vector<256x128xf32> to vector<256x128xbf16>
    %c6 = arith.constant 6 : index
    %c0_85 = arith.constant 0 : index
    %c0_86 = arith.constant 0 : index
    %76 = vector.load %arg5[%c6, %c0_85, %c0_86] : memref<9x128x128xbf16, #tpu.memory_space<vmem>>, vector<1x128x128xbf16>
    %77 = vector.shape_cast %76 : vector<1x128x128xbf16> to vector<128x128xbf16>
    %cst_87 = arith.constant dense<0.000000e+00> : vector<256x128xf32>
    %78 = tpu.matmul %75, %77, %cst_87 {dimension_numbers = #tpu.dot_dimension_numbers<[1], [0], [0], [1], [0, 0, 1, 1], [], []>} : vector<256x128xbf16>, vector<128x128xbf16>, vector<256x128xf32> -> vector<256x128xf32>
    %79 = arith.addf %73, %78 : vector<256x128xf32>
    %c0_88 = arith.constant 0 : index
    %c0_89 = arith.constant 0 : index
    %80 = vector.load %arg13[%c0_88, %c0_89] : memref<256x128xf32, #tpu.memory_space<vmem>>, vector<256x128xf32>
    tpu.vector_store %arg13[%c0_88, %c0_89], %79 {strides = array<i32>} : memref<256x128xf32, #tpu.memory_space<vmem>>, vector<256x128xf32>,
    %c2_90 = arith.constant 2 : index
    %c1_91 = arith.constant 1 : index
    %c0_92 = arith.constant 0 : index
    %81 = vector.load %arg12[%c2_90, %c1_91, %c0_92] : memref<18x18x128xf32, #tpu.memory_space<vmem>>, vector<16x16x128xf32>
    %c0_93 = arith.constant 0 : index
    %c0_94 = arith.constant 0 : index
    %82 = vector.load %arg13[%c0_93, %c0_94] : memref<256x128xf32, #tpu.memory_space<vmem>>, vector<256x128xf32>
    %83 = vector.shape_cast %81 : vector<16x16x128xf32> to vector<256x128xf32>
    %84 = arith.truncf %83 : vector<256x128xf32> to vector<256x128xbf16>
    %c7 = arith.constant 7 : index
    %c0_95 = arith.constant 0 : index
    %c0_96 = arith.constant 0 : index
    %85 = vector.load %arg5[%c7, %c0_95, %c0_96] : memref<9x128x128xbf16, #tpu.memory_space<vmem>>, vector<1x128x128xbf16>
    %86 = vector.shape_cast %85 : vector<1x128x128xbf16> to vector<128x128xbf16>
    %cst_97 = arith.constant dense<0.000000e+00> : vector<256x128xf32>
    %87 = tpu.matmul %84, %86, %cst_97 {dimension_numbers = #tpu.dot_dimension_numbers<[1], [0], [0], [1], [0, 0, 1, 1], [], []>} : vector<256x128xbf16>, vector<128x128xbf16>, vector<256x128xf32> -> vector<256x128xf32>
    %88 = arith.addf %82, %87 : vector<256x128xf32>
    %c0_98 = arith.constant 0 : index
    %c0_99 = arith.constant 0 : index
    %89 = vector.load %arg13[%c0_98, %c0_99] : memref<256x128xf32, #tpu.memory_space<vmem>>, vector<256x128xf32>
    tpu.vector_store %arg13[%c0_98, %c0_99], %88 {strides = array<i32>} : memref<256x128xf32, #tpu.memory_space<vmem>>, vector<256x128xf32>,
    %c2_100 = arith.constant 2 : index
    %c2_101 = arith.constant 2 : index
    %c0_102 = arith.constant 0 : index
    %90 = vector.load %arg12[%c2_100, %c2_101, %c0_102] : memref<18x18x128xf32, #tpu.memory_space<vmem>>, vector<16x16x128xf32>
    %c0_103 = arith.constant 0 : index
    %c0_104 = arith.constant 0 : index
    %91 = vector.load %arg13[%c0_103, %c0_104] : memref<256x128xf32, #tpu.memory_space<vmem>>, vector<256x128xf32>
    %92 = vector.shape_cast %90 : vector<16x16x128xf32> to vector<256x128xf32>
    %93 = arith.truncf %92 : vector<256x128xf32> to vector<256x128xbf16>
    %c8 = arith.constant 8 : index
    %c0_105 = arith.constant 0 : index
    %c0_106 = arith.constant 0 : index
    %94 = vector.load %arg5[%c8, %c0_105, %c0_106] : memref<9x128x128xbf16, #tpu.memory_space<vmem>>, vector<1x128x128xbf16>
    %95 = vector.shape_cast %94 : vector<1x128x128xbf16> to vector<128x128xbf16>
    %cst_107 = arith.constant dense<0.000000e+00> : vector<256x128xf32>
    %96 = tpu.matmul %93, %95, %cst_107 {dimension_numbers = #tpu.dot_dimension_numbers<[1], [0], [0], [1], [0, 0, 1, 1], [], []>} : vector<256x128xbf16>, vector<128x128xbf16>, vector<256x128xf32> -> vector<256x128xf32>
    %97 = arith.addf %91, %96 : vector<256x128xf32>
    %c0_108 = arith.constant 0 : index
    %c0_109 = arith.constant 0 : index
    %98 = vector.load %arg13[%c0_108, %c0_109] : memref<256x128xf32, #tpu.memory_space<vmem>>, vector<256x128xf32>
    tpu.vector_store %arg13[%c0_108, %c0_109], %97 {strides = array<i32>} : memref<256x128xf32, #tpu.memory_space<vmem>>, vector<256x128xf32>,
    %c0_110 = arith.constant 0 : index
    %c0_111 = arith.constant 0 : index
    %99 = vector.load %arg13[%c0_110, %c0_111] : memref<256x128xf32, #tpu.memory_space<vmem>>, vector<256x128xf32>
    %c0_112 = arith.constant 0 : index
    %c0_113 = arith.constant 0 : index
    %100 = vector.load %arg6[%c0_112, %c0_113] : memref<1x128xf32, #tpu.memory_space<vmem>>, vector<1x128xf32>
    %101 = vector.broadcast %100 : vector<1x128xf32> to vector<256x128xf32>
    %102 = arith.mulf %99, %101 : vector<256x128xf32>
    %c0_114 = arith.constant 0 : index
    %c0_115 = arith.constant 0 : index
    %103 = vector.load %arg7[%c0_114, %c0_115] : memref<1x128xf32, #tpu.memory_space<vmem>>, vector<1x128xf32>
    %104 = vector.broadcast %103 : vector<1x128xf32> to vector<256x128xf32>
    %105 = arith.addf %102, %104 : vector<256x128xf32>
    %cst_116 = arith.constant 0.000000e+00 : f32
    %106 = vector.broadcast %cst_116 : f32 to vector<256x128xf32>
    %107 = arith.maximumf %105, %106 : vector<256x128xf32>
    %108 = arith.truncf %107 : vector<256x128xf32> to vector<256x128xbf16>
    %c0_117 = arith.constant 0 : index
    %c0_118 = arith.constant 0 : index
    %109 = vector.load %arg8[%c0_117, %c0_118] : memref<128x128xbf16, #tpu.memory_space<vmem>>, vector<128x128xbf16>
    %cst_119 = arith.constant dense<0.000000e+00> : vector<256x128xf32>
    %110 = tpu.matmul %108, %109, %cst_119 {dimension_numbers = #tpu.dot_dimension_numbers<[1], [0], [0], [1], [0, 0, 1, 1], [], []>} : vector<256x128xbf16>, vector<128x128xbf16>, vector<256x128xf32> -> vector<256x128xf32>
    %c0_120 = arith.constant 0 : index
    %c0_121 = arith.constant 0 : index
    %111 = vector.load %arg9[%c0_120, %c0_121] : memref<1x128xf32, #tpu.memory_space<vmem>>, vector<1x128xf32>
    %112 = vector.broadcast %111 : vector<1x128xf32> to vector<256x128xf32>
    %113 = arith.mulf %110, %112 : vector<256x128xf32>
    %c0_122 = arith.constant 0 : index
    %c0_123 = arith.constant 0 : index
    %114 = vector.load %arg10[%c0_122, %c0_123] : memref<1x128xf32, #tpu.memory_space<vmem>>, vector<1x128xf32>
    %115 = vector.broadcast %114 : vector<1x128xf32> to vector<256x128xf32>
    %116 = arith.addf %113, %115 : vector<256x128xf32>
    %117 = arith.extf %1 : vector<256x128xbf16> to vector<256x128xf32>
    %118 = arith.addf %116, %117 : vector<256x128xf32>
    %cst_124 = arith.constant 0.000000e+00 : f32
    %119 = vector.broadcast %cst_124 : f32 to vector<256x128xf32>
    %120 = arith.maximumf %118, %119 : vector<256x128xf32>
    %c0_125 = arith.constant 0 : index
    %c0_126 = arith.constant 0 : index
    %c0_127 = arith.constant 0 : index
    %121 = vector.load %arg11[%c0_125, %c0_126, %c0_127] : memref<1x256x128xf32, #tpu.memory_space<vmem>>, vector<1x256x128xf32>
    %122 = vector.shape_cast %121 : vector<1x256x128xf32> to vector<256x128xf32>
    %123 = vector.shape_cast %120 : vector<256x128xf32> to vector<1x256x128xf32>
    tpu.vector_store %arg11[%c0_125, %c0_126, %c0_127], %123 {strides = array<i32>} : memref<1x256x128xf32, #tpu.memory_space<vmem>>, vector<1x256x128xf32>,
    return
  }
  func.func @transform_0(%arg0: i32) -> (i32, i32, i32) {
    %c0_i32 = arith.constant 0 : i32
    %c0_i32_0 = arith.constant 0 : i32
    %c0_i32_1 = arith.constant 0 : i32
    return %arg0, %c0_i32, %c0_i32_0 : i32, i32, i32
  }
  func.func @transform_1(%arg0: i32) -> (i32, i32) {
    %c0_i32 = arith.constant 0 : i32
    %c0_i32_0 = arith.constant 0 : i32
    %c0_i32_1 = arith.constant 0 : i32
    return %c0_i32, %c0_i32_0 : i32, i32
  }
  func.func @transform_2(%arg0: i32) -> (i32, i32) {
    %c0_i32 = arith.constant 0 : i32
    %c0_i32_0 = arith.constant 0 : i32
    %c0_i32_1 = arith.constant 0 : i32
    return %c0_i32, %c0_i32_0 : i32, i32
  }
  func.func @transform_3(%arg0: i32) -> (i32, i32) {
    %c0_i32 = arith.constant 0 : i32
    %c0_i32_0 = arith.constant 0 : i32
    %c0_i32_1 = arith.constant 0 : i32
    return %c0_i32, %c0_i32_0 : i32, i32
  }
  func.func @transform_4(%arg0: i32) -> (i32, i32, i32) {
    %c0_i32 = arith.constant 0 : i32
    %c0_i32_0 = arith.constant 0 : i32
    %c0_i32_1 = arith.constant 0 : i32
    %c0_i32_2 = arith.constant 0 : i32
    return %c0_i32, %c0_i32_0, %c0_i32_1 : i32, i32, i32
  }
  func.func @transform_5(%arg0: i32) -> (i32, i32) {
    %c0_i32 = arith.constant 0 : i32
    %c0_i32_0 = arith.constant 0 : i32
    %c0_i32_1 = arith.constant 0 : i32
    return %c0_i32, %c0_i32_0 : i32, i32
  }
  func.func @transform_6(%arg0: i32) -> (i32, i32) {
    %c0_i32 = arith.constant 0 : i32
    %c0_i32_0 = arith.constant 0 : i32
    %c0_i32_1 = arith.constant 0 : i32
    return %c0_i32, %c0_i32_0 : i32, i32
  }
  func.func @transform_7(%arg0: i32) -> (i32, i32) {
    %c0_i32 = arith.constant 0 : i32
    %c0_i32_0 = arith.constant 0 : i32
    %c0_i32_1 = arith.constant 0 : i32
    return %c0_i32, %c0_i32_0 : i32, i32
  }
  func.func @transform_8(%arg0: i32) -> (i32, i32) {
    %c0_i32 = arith.constant 0 : i32
    %c0_i32_0 = arith.constant 0 : i32
    %c0_i32_1 = arith.constant 0 : i32
    return %c0_i32, %c0_i32_0 : i32, i32
  }
  func.func @transform_9(%arg0: i32) -> (i32, i32) {
    %c0_i32 = arith.constant 0 : i32
    %c0_i32_0 = arith.constant 0 : i32
    %c0_i32_1 = arith.constant 0 : i32
    return %c0_i32, %c0_i32_0 : i32, i32
  }
  func.func @transform_10(%arg0: i32) -> (i32, i32, i32) {
    %c0_i32 = arith.constant 0 : i32
    %c0_i32_0 = arith.constant 0 : i32
    %c0_i32_1 = arith.constant 0 : i32
    return %arg0, %c0_i32, %c0_i32_0 : i32, i32, i32
  }
}

</mosaic_0001>

<bundles_post_ra>
// kernel: bottleneck_forward.1
= control target key start
LH: loop header
LB: loop body
LE: loop exit
PB: predicated region body
PF: predicated region fallthrough
CT: control target
= control target key end

     0   :  { %15 = vsyncpa [#allocation5], 0  ;;  %s7474_s0 = inlined_call_operand.vmem [shape: bf16[2,256,128], index: 0, kind: input, shape index: {}]   ;;  %s7475_s1 = inlined_call_operand.vmem [shape: bf16[128,128], index: 1, kind: input, shape index: {}]   ;;  %s7476_s2 = inlined_call_operand.vmem [shape: f32[1,128], index: 2, kind: input, shape index: {}]   ;;  %s7477_s3 = inlined_call_operand.vmem [shape: f32[1,128], index: 3, kind: input, shape index: {}]   ;;  %s7478_s4 = inlined_call_operand.vmem [shape: bf16[9,128,128], index: 4, kind: input, shape index: {}]   ;;  %s7479_s5 = inlined_call_operand.vmem [shape: f32[1,128], index: 5, kind: input, shape index: {}]   ;;  %s7480_s6 = inlined_call_operand.vmem [shape: f32[1,128], index: 6, kind: input, shape index: {}]   ;;  %s7481_s7 = inlined_call_operand.vmem [shape: bf16[128,128], index: 7, kind: input, shape index: {}]   ;;  %s7482_s8 = inlined_call_operand.vmem [shape: f32[1,128], index: 8, kind: input, shape index: {}]   ;;  %s7483_s9 = inlined_call_operand.vmem [shape: f32[1,128], index: 9, kind: input, shape index: {}]   ;;  %s7484_s10 = inlined_call_operand.hbm [shape: f32[2,256,128], index: 10, kind: output, shape index: {}]  }
   0x1   :  { %17 = vsyncpa [#allocation5 + $0x1], 0  ;;  %s6555_s13 = smov 0   ;;  %s6557_s14 = smov 0  }
   0x2   :  { %s6559_s15 = smov 0   ;;  %s6561_s16 = smov 0  }
   0x3 LB: > { %s6576_s17 = sadd.s32 4294967295, %s6493_s16   ;;  %s4936_s18 = sadd.s32 4294967294, %s6493_s16   ;;  %s6493_s16 = sphi %s6561_s16, %s7490_s16   ;;  %s6489_s15 = sphi %s6559_s15, %s7489_s15   ;;  %s6485_s14 = sphi %s6557_s14, %s7488_s14   ;;  %s6481_s13 = sphi %s6555_s13, %s7487_s13  }
   0x4   : > { %s6580_s19 = sadd.s32 1, %s6493_s16   ;;  %s245_s20 = sadd.s32 1, %s6489_s15 }
   0x5   : > { %s242_s21 = ssub.s32 %s6493_s16, %s6580_s19  ;;  %p255_p0 = scmp.ne.s32.totalorder %s6489_s15, %s6485_s14 }
   0x6   : > { %p243_p1 = scmp.eq.s32.totalorder %s242_s21, 0  ;;  %p256_p2 = scmp.eq.s32.totalorder %s6576_s17, 1 }
   0x7   : > { %p261_p3 = scmp.ne.s32.totalorder %s6485_s14, %s6481_s13  ;;  %p262_p4 = scmp.eq.s32.totalorder %s4936_s18, 1 }
   0x8   : > { %s6591_s22 = scalar_select %p243_p1, %s6489_s15, %s245_s20  }
   0x9   : > { %p6593_p5 = por %p256_p2, %p255_p0  ;;  %p6597_p6 = por %p262_p4, %p261_p3 }
   0xa   : > { %p4939_p7 = scmp.ge.s32.totalorder %s6493_s16, 1  ;;  %p315_p8 = scmp.lt.s32.totalorder %s6493_s16, 3 }
   0xc   : > { %p316_p9 = pnand %p4939_p7, %p315_p8 }
   0xd   : > { %v6294_v0 = vld [vmem:[%s7475_s1] sm:$0xff] (!%p316_p9)   ;;  %p353_p10 = scmp.lt.s32.totalorder (!%p316_p9), %s6576_s17, 1  ;;  %v6295_v1 = vld [vmem:[%s7475_s1 + $0x8] sm:$0xff] (!%p316_p9)   ;;  %v6296_v2 = vld [vmem:[%s7475_s1 + $0x10] sm:$0xff] (!%p316_p9)   ;;  %v6495_v29 = vmov (!%p316_p9), 0.0   ;;  %v6496_v33 = vmov (!%p316_p9), 0.0|0.0  }
   0xe   : > { %319 = sbr.rel (%p316_p9) target bundleno = 1118 (0x45e), region = 60  ;;  %5452 = vmatprep.subr.bf16.mxu0 (!%p316_p9), %v6294_v0  ;;  %v6297_v3 = vld [vmem:[%s7475_s1 + $0x18] sm:$0xff] (!%p316_p9)   ;;  %v6298_v5 = vld [vmem:[%s7475_s1 + $0x20] sm:$0xff] (!%p316_p9)   ;;  %v6299_v6 = vld [vmem:[%s7475_s1 + $0x28] sm:$0xff] (!%p316_p9)   ;;  %828 = vst [vmem:[#allocation2 + $0x30] sm:$0xff] (!%p316_p9), %v6495_v29  ;;  %s350_s25 = sand.u32 (!%p316_p9), 1, %s6485_s14  }
   0xf   : > { %5453 = vmatpush3.bf16.msra.mxu0 (!%p316_p9), %v6294_v0  ;;  %v6300_v7 = vld [vmem:[%s7475_s1 + $0x30] sm:$0xff] (!%p316_p9)   ;;  %v6301_v8 = vld [vmem:[%s7475_s1 + $0x38] sm:$0xff] (!%p316_p9)   ;;  %v6318_v11 = vld [vmem:[%s7478_s4] sm:$0xff] (!%p316_p9)   ;;  %829 = vst [vmem:[#allocation2 + $0x38] sm:$0xff] (!%p316_p9), %v6495_v29  ;;  %s4940_s28 = sshll.u32 (!%p316_p9), %s350_s25, 8  ;;  %s6497_s26 = smov (!%p316_p9), [#allocation4]  }
  0x10   : > { %5454 = vmatprep.subr.bf16.mxu0 (!%p316_p9), %v6295_v1  ;;  %v6319_v12 = vld [vmem:[%s7478_s4 + $0x8] sm:$0xff] (!%p316_p9)   ;;  %v6320_v15 = vld [vmem:[%s7478_s4 + $0x10] sm:$0xff] (!%p316_p9)   ;;  %v6321_v27 = vld [vmem:[%s7478_s4 + $0x18] sm:$0xff] (!%p316_p9)   ;;  %822 = vst [vmem:[#allocation2] sm:$0xff] (!%p316_p9), %v6495_v29  ;;  %s6435_s27 = sshll.u32 (!%p316_p9), %s6497_s26, 4  ;;  %s6436_s27 = int_to_ptr.vmem [resolvable:$false] %s6435_s27 }
  0x11   : > { %v6322_v28 = vld [vmem:[%s7478_s4 + $0x20] sm:$0xff] (!%p316_p9)   ;;  %823 = vst [vmem:[#allocation2 + $0x8] sm:$0xff] (!%p316_p9), %v6495_v29  ;;  %824 = vst [vmem:[#allocation2 + $0x10] sm:$0x3] (!%p316_p9), %v6495_v29  ;;  %v6323_v30 = vld [vmem:[%s7478_s4 + $0x28] sm:$0xff] (!%p316_p9)  }
  0x12   : > { %825 = vst [vmem:[#allocation2 + $0x18] sm:$0xff] (!%p316_p9), %v6495_v29  ;;  %826 = vst [vmem:[#allocation2 + $0x20] sm:$0xff] (!%p316_p9), %v6495_v29  ;;  %v6324_v31 = vld [vmem:[%s7478_s4 + $0x30] sm:$0xff] (!%p316_p9)   ;;  %v6325_v32 = vld [vmem:[%s7478_s4 + $0x38] sm:$0xff] (!%p316_p9)  }
  0x13   : > { %5455 = vmatpush3.bf16.msra.mxu0 (!%p316_p9), %v6295_v1  ;;  %827 = vst [vmem:[#allocation2 + $0x28] sm:$0x3] (!%p316_p9), %v6495_v29  ;;  %830 = vst [vmem:[#allocation2 + $0x40] sm:$0x3] (!%p316_p9), %v6495_v29  ;;  %v6677_v34 = vld [vmem:[%s7478_s4 + $0xc0] sm:$0xff] (!%p316_p9)   ;;  %v6684_v35 = vld [vmem:[%s7478_s4 + $0xc8] sm:$0xff] (!%p316_p9)  }
  0x14   : > { %5456 = vmatprep.subr.bf16.mxu0 (!%p316_p9), %v6296_v2  ;;  %831 = vst [vmem:[#allocation2 + $0x48] sm:$0xff] (!%p316_p9), %v6495_v29  ;;  %832 = vst [vmem:[#allocation2 + $0x50] sm:$0xff] (!%p316_p9), %v6495_v29  ;;  %5980 = vmatprep.subr.bf16.mxu1 (!%p316_p9), %v6677_v34  ;;  %v6691_v36 = vld [vmem:[%s7478_s4 + $0xd0] sm:$0xff] (!%p316_p9)   ;;  %v6698_v37 = vld [vmem:[%s7478_s4 + $0xd8] sm:$0xff] (!%p316_p9)  }
  0x15   : > { %s354_s29 = scalar_select %p353_p10, %s6576_s17, 1  ;;  %833 = vst [vmem:[#allocation2 + $0x58] sm:$0x3] %v6495_v29  ;;  %834 = vst [vmem:[#allocation2 + $0x60] sm:$0xff] %v6495_v29  ;;  %5988 = vmatpush3.bf16.msra.mxu1 %v6677_v34  ;;  %v6705_v38 = vld [vmem:[%s7478_s4 + $0xe0] sm:$0xff]   ;;  %v6712_v39 = vld [vmem:[%s7478_s4 + $0xe8] sm:$0xff]  }
  0x16   : > { %835 = vst [vmem:[#allocation2 + $0x68] sm:$0xff] %v6495_v29  ;;  %836 = vst [vmem:[#allocation2 + $0x70] sm:$0x3] %v6495_v29  ;;  %5981 = vmatprep.subr.bf16.mxu1 %v6684_v35  ;;  %v6719_v40 = vld [vmem:[%s7478_s4 + $0xf0] sm:$0xff]   ;;  %v6726_v41 = vld [vmem:[%s7478_s4 + $0xf8] sm:$0xff]  }
  0x17   : > { %s5186_s12 = sshll.u32 %s354_s29, 7  ;;  %5457 = vmatpush3.bf16.msra.mxu0 %v6296_v2  ;;  %837 = vst [vmem:[#allocation2 + $0x78] sm:$0xff] %v6495_v29  ;;  %838 = vst [vmem:[#allocation2 + $0x80] sm:$0xff] %v6495_v29  ;;  %v6733_v42 = vld [vmem:[%s7478_s4 + $0x40] sm:$0xff]   ;;  %s7319_s29 = scalar_lea.vmem [#allocation4], %s4940_s28 }
  0x18   : > { %s6617_s21 = scalar_lea.vmem %s7474_s0, %s5186_s12  ;;  %5458 = vmatprep.subr.bf16.mxu0 %v6297_v3  ;;  %839 = vst [vmem:[#allocation2 + $0x88] sm:$0x3] %v6495_v29  ;;  %840 = vst [vmem:[#allocation2 + $0x90] sm:$0xff] %v6495_v29  ;;  %v6738_v43 = vld [vmem:[%s7478_s4 + $0x100] sm:$0xff]   ;;  %s4874_s30 = sshll.u32 %s7319_s29, 4  ;;  %s7426_s30 = int_to_ptr.vmem [resolvable:$true] %s4874_s30 }
  0x19   : > { %v359_v4 = vld [vmem:[%s6617_s21] sm:$0xff]   ;;  %v361_v9 = vld [vmem:[%s6617_s21 + $0x8] sm:$0xff]   ;;  %v363_v10 = vld [vmem:[%s6617_s21 + $0x10] sm:$0xff]   ;;  %841 = vst [vmem:[#allocation2 + $0x98] sm:$0xff] %v6495_v29  ;;  %5989 = vmatpush3.bf16.msra.mxu1 %v6684_v35  ;;  %s6431_s20 = scalar_lea.vmem %s7426_s30, 4096  ;;  %s6437_s28 = scalar_lea.vmem %s6436_s27, 8192 }
  0x1a   : > { %5468 = vmatprep.mubr.bf16.mxu0 %v359_v4  ;;  %v365_v13 = vld [vmem:[%s6617_s21 + $0x18] sm:$0xff]   ;;  %v367_v14 = vld [vmem:[%s6617_s21 + $0x20] sm:$0xff]   ;;  %v369_v16 = vld [vmem:[%s6617_s21 + $0x28] sm:$0xff]   ;;  %842 = vst [vmem:[#allocation2 + $0xa0] sm:$0x3] %v6495_v29  ;;  %5982 = vmatprep.subr.bf16.mxu1 %v6691_v36  ;;  %p6432_p11 = scmp.ne.s32.totalorder %s7426_s30, %s6431_s20  ;;  %p6438_p0 = scmp.lt.s32.totalorder %s7426_s30, %s6436_s27 }
  0x1b   : > { %5459 = vmatpush3.bf16.msra.mxu0 %v6297_v3  ;;  %v371_v17 = vld [vmem:[%s6617_s21 + $0x30] sm:$0xff]   ;;  %v373_v18 = vld [vmem:[%s6617_s21 + $0x38] sm:$0xff]   ;;  %v375_v19 = vld [vmem:[%s6617_s21 + $0x40] sm:$0xff]   ;;  %843 = vst [vmem:[#allocation2 + $0xa8] sm:$0xff] %v6495_v29  ;;  %p6439_p1 = scmp.lt.s32.totalorder %s6437_s28, %s6431_s20 }
  0x1c   : > { %5460 = vmatprep.subr.bf16.mxu0 %v6298_v5  ;;  %v377_v20 = vld [vmem:[%s6617_s21 + $0x48] sm:$0xff]   ;;  %v379_v21 = vld [vmem:[%s6617_s21 + $0x50] sm:$0xff]   ;;  %v381_v22 = vld [vmem:[%s6617_s21 + $0x58] sm:$0xff]   ;;  %844 = vst [vmem:[#allocation2 + $0xb0] sm:$0xff] %v6495_v29  ;;  %p6433_p12 = pnand %p6432_p11, %p6593_p5 }
  0x1d   : > { %v383_v23 = vld [vmem:[%s6617_s21 + $0x60] sm:$0xff]   ;;  %v385_v24 = vld [vmem:[%s6617_s21 + $0x68] sm:$0xff]   ;;  %v387_v25 = vld [vmem:[%s6617_s21 + $0x70] sm:$0xff]   ;;  %845 = vst [vmem:[#allocation2 + $0xb8] sm:$0x3] %v6495_v29  ;;  %5990 = vmatpush3.bf16.msra.mxu1 %v6691_v36  ;;  %p6440_p2 = por %p6439_p1, %p6438_p0 }
  0x1e   : > { %v389_v26 = vld [vmem:[%s6617_s21 + $0x78] sm:$0xff]   ;;  %846 = vst [vmem:[#allocation2 + $0xc0] sm:$0xff] %v6495_v29  ;;  %847 = vst [vmem:[#allocation2 + $0xc8] sm:$0xff] %v6495_v29  ;;  %5983 = vmatprep.subr.bf16.mxu1 %v6698_v37  ;;  %v6745_v44 = vld [vmem:[%s7476_s2] ss:$0 sm:$0xff]  ;;  %p6434_p13 = pneg %p6433_p12 }
  0x1f   : > { %5461 = vmatpush3.bf16.msra.mxu0 %v6298_v5  ;;  %848 = vst [vmem:[#allocation2 + $0xd0] sm:$0x3] %v6495_v29  ;;  %849 = vst [vmem:[#allocation2 + $0xd8] sm:$0xff] %v6495_v29  ;;  %v6750_v46 = vld [vmem:[%s7477_s3] ss:$0 sm:$0xff] }
  0x20   : > { %5462 = vmatprep.subr.bf16.mxu0 %v6299_v6  ;;  %850 = vst [vmem:[#allocation2 + $0xe0] sm:$0xff] %v6495_v29  ;;  %851 = vst [vmem:[#allocation2 + $0xe8] sm:$0x3] %v6495_v29  ;;  %p6441_p3 = pnand %p6440_p2, %p6434_p13 }
  0x21   : > { %852 = vst [vmem:[#allocation2 + $0xf0] sm:$0xff] %v6495_v29  ;;  %853 = vst [vmem:[#allocation2 + $0xf8] sm:$0xff] %v6495_v29  ;;  %5991 = vmatpush3.bf16.msra.mxu1 %v6698_v37 }
  0x22   : > { %854 = vst [vmem:[#allocation2 + $0x100] sm:$0x3] %v6495_v29  ;;  %855 = vst [vmem:[#allocation2 + $0x108] sm:$0xff] %v6495_v29  ;;  %5984 = vmatprep.subr.bf16.mxu1 %v6705_v38 }
  0x23   : > { %5463 = vmatpush3.bf16.msra.mxu0 %v6299_v6  ;;  %856 = vst [vmem:[#allocation2 + $0x110] sm:$0xff] %v6495_v29  ;;  %857 = vst [vmem:[#allocation2 + $0x118] sm:$0x3] %v6495_v29 }
  0x24   : > { %5464 = vmatprep.subr.bf16.mxu0 %v6300_v7  ;;  %858 = vst [vmem:[#allocation2 + $0x120] sm:$0xff] %v6495_v29  ;;  %859 = vst [vmem:[#allocation2 + $0x128] sm:$0xff] %v6495_v29 }
  0x25   : > { %860 = vst [vmem:[#allocation2 + $0x130] sm:$0x3] %v6495_v29  ;;  %861 = vst [vmem:[#allocation2 + $0x138] sm:$0xff] %v6495_v29  ;;  %5992 = vmatpush3.bf16.msra.mxu1 %v6705_v38 }
  0x26   : > { %862 = vst [vmem:[#allocation2 + $0x140] sm:$0xff] %v6495_v29  ;;  %863 = vst [vmem:[#allocation2 + $0x148] sm:$0x3] %v6495_v29  ;;  %5985 = vmatprep.subr.bf16.mxu1 %v6712_v39 }
  0x27   : > { %5465 = vmatpush3.bf16.msra.mxu0 %v6300_v7  ;;  %864 = vst [vmem:[#allocation2 + $0x150] sm:$0xff] %v6495_v29  ;;  %865 = vst [vmem:[#allocation2 + $0x158] sm:$0xff] %v6495_v29 }
  0x28   : > { %5466 = vmatprep.subr.bf16.mxu0 %v6301_v8  ;;  %866 = vst [vmem:[#allocation2 + $0x160] sm:$0x3] %v6495_v29  ;;  %867 = vst [vmem:[#allocation2 + $0x168] sm:$0xff] %v6495_v29 }
  0x29   : > { %868 = vst [vmem:[#allocation2 + $0x170] sm:$0xff] %v6495_v29  ;;  %869 = vst [vmem:[#allocation2 + $0x178] sm:$0x3] %v6495_v29  ;;  %5993 = vmatpush3.bf16.msra.mxu1 %v6712_v39 }
  0x2a   : > { %870 = vst [vmem:[#allocation2 + $0x180] sm:$0xff] %v6495_v29  ;;  %871 = vst [vmem:[#allocation2 + $0x188] sm:$0xff] %v6495_v29  ;;  %5986 = vmatprep.subr.bf16.mxu1 %v6719_v40 }
  0x2b   : > { %5467 = vmatpush3.bf16.msra.mxu0 %v6301_v8  ;;  %872 = vst [vmem:[#allocation2 + $0x190] sm:$0x3] %v6495_v29  ;;  %873 = vst [vmem:[#allocation2 + $0x198] sm:$0xff] %v6495_v29 }
  0x2c   : > { %5500 = vmatprep.subr.bf16.mxu0 %v6318_v11  ;;  %874 = vst [vmem:[#allocation2 + $0x1a0] sm:$0xff] %v6495_v29  ;;  %875 = vst [vmem:[#allocation2 + $0x1a8] sm:$0x3] %v6495_v29 }
  0x2d   : > { %5994 = vmatpush3.bf16.msra.mxu1 %v6719_v40 }
  0x2e   : > { %5469 = vmatmul.mubr.bf16.vlgmr.msra.gmra.mrb[0].mxu0 %v361_v9  ;;  %5987 = vmatprep.subr.bf16.mxu1 %v6726_v41 }
  0x2f   : > { %5472 = vmatprep.mubr.bf16.mxu0 %v363_v10  ;;  %5501 = vmatpush3.bf16.msra.mxu0 %v6318_v11 }
  0x30   : > { %5502 = vmatprep.subr.bf16.mxu0 %v6319_v12 }
  0x31   : > { %5995 = vmatpush3.bf16.msra.mxu1 %v6726_v41 }
  0x32   : > { %5692 = vmatprep.subr.bf16.mxu1 %v6738_v43 }
  0x33   : > { %5503 = vmatpush3.bf16.msra.mxu0 %v6319_v12 }
  0x34   : > { %5504 = vmatprep.subr.bf16.mxu0 %v6320_v15 }
  0x36   : > { %5473 = vmatmul.mubr.bf16.gmra.mrb[4].mxu0 %v365_v13 }
  0x37   : > { %5476 = vmatprep.mubr.bf16.mxu0 %v367_v14  ;;  %5505 = vmatpush3.bf16.msra.mxu0 %v6320_v15 }
  0x38   : > { %5506 = vmatprep.subr.bf16.mxu0 %v6321_v27 }
  0x3b   : > { %5507 = vmatpush3.bf16.msra.mxu0 %v6321_v27  ;;  %v6336_v27 = vld [vmem:[%s7478_s4 + $0x48] sm:$0xff]  }
  0x3c   : > { %5508 = vmatprep.subr.bf16.mxu0 %v6322_v28 }
  0x3e   : > { %5477 = vmatmul.mubr.bf16.gmra.mrb[8].mxu0 %v369_v16 }
  0x3f   : > { %5480 = vmatprep.mubr.bf16.mxu0 %v371_v17  ;;  %5509 = vmatpush3.bf16.msra.mxu0 %v6322_v28 }
  0x40   : > { %5510 = vmatprep.subr.bf16.mxu0 %v6323_v30 }
  0x43   : > { %5511 = vmatpush3.bf16.msra.mxu0 %v6323_v30 }
  0x44   : > { %5512 = vmatprep.subr.bf16.mxu0 %v6324_v31 }
  0x46   : > { %5481 = vmatmul.mubr.bf16.gmra.mrb[12].mxu0 %v373_v18 }
  0x47   : > { %5484 = vmatprep.mubr.bf16.mxu0 %v375_v19  ;;  %5513 = vmatpush3.bf16.msra.mxu0 %v6324_v31 }
  0x48   : > { %5514 = vmatprep.subr.bf16.mxu0 %v6325_v32 }
  0x4b   : > { %5515 = vmatpush3.bf16.msra.mxu0 %v6325_v32 }
  0x4c   : > { %5548 = vmatprep.subr.bf16.mxu0 %v6733_v42 }
  0x4e   : > { %5485 = vmatmul.mubr.bf16.gmra.mrb[16].mxu0 %v377_v20 }
  0x4f   : > { %5488 = vmatprep.mubr.bf16.mxu0 %v379_v21 }
  0x56   : > { %5489 = vmatmul.mubr.bf16.gmra.mrb[20].mxu0 %v381_v22 }
  0x57   : > { %5492 = vmatprep.mubr.bf16.mxu0 %v383_v23 }
  0x5e   : > { %5493 = vmatmul.mubr.bf16.gmra.mrb[24].mxu0 %v385_v24 }
  0x5f   : > { %5496 = vmatprep.mubr.bf16.mxu0 %v387_v25 }
  0x66   : > { %5497 = vmatmul.mubr.bf16.gmra.mrb[28].mxu0 %v389_v26 }
  0x67   : > { %5516 = vmatprep.mubr.bf16.mxu0 %v6496_v33 }
 0x101   : > { %v5470_v45 = vpop.f32.mrb[0].mxu0 }
 0x102   : > { %v721_v47 = vmul.f32 %v5470_v45, %v6745_v44  ;;  %v585_v48 = vpop.f32.mrb[1].mxu0 }
 0x103   : > { %v719_v49 = vmul.f32 %v6745_v44, %v585_v48  ;;  %v5471_v50 = vpop.f32.mrb[2].mxu0 }
 0x104   : > { %v760_v51 = vadd.f32 %v6750_v46, %v721_v47  ;;  %v722_v52 = vmul.f32 %v5471_v50, %v6745_v44  ;;  %v588_v53 = vpop.f32.mrb[3].mxu0 }
 0x105   : > { %v758_v54 = vadd.f32 %v6750_v46, %v719_v49  ;;  %v720_v55 = vmul.f32 %v6745_v44, %v588_v53 }
 0x106   : > { %v792_v56 = vmax.f32 %v760_v51, 0.0  ;;  %v761_v57 = vadd.f32 %v6750_v46, %v722_v52  ;;  %v6338_v51 = vld [vmem:[%s7478_s4 + $0x50] sm:$0xff]  }
 0x107   : > { %v790_v58 = vmax.f32 %v758_v54, 0.0  ;;  %v759_v59 = vadd.f32 %v6750_v46, %v720_v55 }
 0x108   : > { %879 = vst [vmem:[#allocation2 + $0x31] sm:$0xff] %v792_v56  ;;  %v793_v60 = vmax.f32 %v761_v57, 0.0 }
 0x109   : > { %877 = vst [vmem:[#allocation2 + $0x19] sm:$0xff] %v790_v58  ;;  %v791_v61 = vmax.f32 %v759_v59, 0.0  ;;  %v5474_v62 = vpop.f32.mrb[4].mxu0 }
 0x10a   : > { %880 = vst [vmem:[#allocation2 + $0x39] sm:$0xff] %v793_v60  ;;  %v725_v63 = vmul.f32 %v5474_v62, %v6745_v44  ;;  %v601_v0 = vpop.f32.mrb[5].mxu0  ;;  %v6761_v1 = vpack.c.bf16 %v793_v60, %v792_v56 }
 0x10b   : > { %878 = vst [vmem:[#allocation2 + $0x21] sm:$0xff] %v791_v61  ;;  %v723_v2 = vmul.f32 %v6745_v44, %v601_v0  ;;  %v5475_v3 = vpop.f32.mrb[6].mxu0  ;;  %v6764_v4 = vpack.c.bf16 %v791_v61, %v790_v58  ;;  %v6340_v0 = vld [vmem:[%s7478_s4 + $0x58] sm:$0xff]  }
 0x10c   : > { %v764_v5 = vadd.f32 %v6750_v46, %v725_v63  ;;  %v726_v6 = vmul.f32 %v5475_v3, %v6745_v44  ;;  %v604_v7 = vpop.f32.mrb[7].mxu0 }
 0x10d   : > { %v762_v8 = vadd.f32 %v6750_v46, %v723_v2  ;;  %v724_v9 = vmul.f32 %v6745_v44, %v604_v7 }
 0x10e   : > { %v796_v10 = vmax.f32 %v764_v5, 0.0  ;;  %v765_v11 = vadd.f32 %v6750_v46, %v726_v6 }
 0x10f   : > { %v794_v12 = vmax.f32 %v762_v8, 0.0  ;;  %v763_v13 = vadd.f32 %v6750_v46, %v724_v9  ;;  %v945_v26 = vld [vmem:[#allocation2 + $0x30] sm:$0xff] }
 0x110   : > { %883 = vst [vmem:[#allocation2 + $0x61] sm:$0xff] %v796_v10  ;;  %v797_v14 = vmax.f32 %v765_v11, 0.0  ;;  %v943_v20 = vld [vmem:[#allocation2 + $0x18] sm:$0xff] }
 0x111   : > { %881 = vst [vmem:[#allocation2 + $0x49] sm:$0xff] %v794_v12  ;;  %v795_v15 = vmax.f32 %v763_v13, 0.0  ;;  %v5478_v16 = vpop.f32.mrb[8].mxu0  ;;  %v946_v17 = vld [vmem:[#allocation2 + $0x38] sm:$0xff] }
 0x112   : > { %884 = vst [vmem:[#allocation2 + $0x69] sm:$0xff] %v797_v14  ;;  %v729_v18 = vmul.f32 %v5478_v16, %v6745_v44  ;;  %v617_v19 = vpop.f32.mrb[9].mxu0  ;;  %v944_v21 = vld [vmem:[#allocation2 + $0x20] sm:$0xff]  ;;  %v6773_v22 = vpack.c.bf16 %v797_v14, %v796_v10  ;;  %v1007_v32 = vpack.c.bf16 %v946_v17, %v945_v26 }
 0x113   : > { %882 = vst [vmem:[#allocation2 + $0x51] sm:$0xff] %v795_v15  ;;  %v727_v23 = vmul.f32 %v6745_v44, %v617_v19  ;;  %v5479_v24 = vpop.f32.mrb[10].mxu0  ;;  %v1006_v25 = vpack.c.bf16 %v944_v21, %v943_v20  ;;  %v6779_v28 = vpack.c.bf16 %v795_v15, %v794_v12  ;;  %v6342_v14 = vld [vmem:[%s7478_s4 + $0x60] sm:$0xff]  }
 0x114   : > { %v768_v29 = vadd.f32 %v6750_v46, %v729_v18  ;;  %v730_v30 = vmul.f32 %v5479_v24, %v6745_v44  ;;  %v620_v31 = vpop.f32.mrb[11].mxu0 }
 0x115   : > { %v766_v33 = vadd.f32 %v6750_v46, %v727_v23  ;;  %v728_v45 = vmul.f32 %v6745_v44, %v620_v31  ;;  %5517 = vmatmul.mubr.bf16.vlgmr.msra.gmra.mrb[32].mxu0 %v1006_v25 }
 0x116   : > { %v800_v47 = vmax.f32 %v768_v29, 0.0  ;;  %v769_v48 = vadd.f32 %v6750_v46, %v730_v30  ;;  %5520 = vmatprep.mubr.bf16.mxu0 %v1007_v32  ;;  %5549 = vmatpush3.bf16.msra.mxu0 %v6733_v42  ;;  %v6344_v30 = vld [vmem:[%s7478_s4 + $0x68] sm:$0xff]  }
 0x117   : > { %v798_v49 = vmax.f32 %v766_v33, 0.0  ;;  %v767_v50 = vadd.f32 %v6750_v46, %v728_v45  ;;  %5550 = vmatprep.subr.bf16.mxu0 %v6336_v27  ;;  %v949_v63 = vld [vmem:[#allocation2 + $0x60] sm:$0xff] }
 0x118   : > { %887 = vst [vmem:[#allocation2 + $0x91] sm:$0xff] %v800_v47  ;;  %v801_v52 = vmax.f32 %v769_v48, 0.0  ;;  %v947_v58 = vld [vmem:[#allocation2 + $0x48] sm:$0xff] }
 0x119   : > { %885 = vst [vmem:[#allocation2 + $0x79] sm:$0xff] %v798_v49  ;;  %v799_v53 = vmax.f32 %v767_v50, 0.0  ;;  %v5482_v54 = vpop.f32.mrb[12].mxu0  ;;  %v950_v55 = vld [vmem:[#allocation2 + $0x68] sm:$0xff] }
 0x11a   : > { %888 = vst [vmem:[#allocation2 + $0x99] sm:$0xff] %v801_v52  ;;  %v733_v56 = vmul.f32 %v5482_v54, %v6745_v44  ;;  %v633_v57 = vpop.f32.mrb[13].mxu0  ;;  %v948_v42 = vld [vmem:[#allocation2 + $0x50] sm:$0xff]  ;;  %5551 = vmatpush3.bf16.msra.mxu0 %v6336_v27  ;;  %v6792_v59 = vpack.c.bf16 %v801_v52, %v800_v47  ;;  %v1009_v7 = vpack.c.bf16 %v950_v55, %v949_v63 }
 0x11b   : > { %886 = vst [vmem:[#allocation2 + $0x81] sm:$0xff] %v799_v53  ;;  %v731_v60 = vmul.f32 %v6745_v44, %v633_v57  ;;  %v5483_v61 = vpop.f32.mrb[14].mxu0  ;;  %v1008_v62 = vpack.c.bf16 %v948_v42, %v947_v58  ;;  %5552 = vmatprep.subr.bf16.mxu0 %v6338_v51  ;;  %v6798_v2 = vpack.c.bf16 %v799_v53, %v798_v49  ;;  %v6346_v54 = vld [vmem:[%s7478_s4 + $0x70] sm:$0xff]  }
 0x11c   : > { %v772_v3 = vadd.f32 %v6750_v46, %v733_v56  ;;  %v734_v5 = vmul.f32 %v5483_v61, %v6745_v44  ;;  %v636_v6 = vpop.f32.mrb[15].mxu0 }
 0x11d   : > { %v770_v8 = vadd.f32 %v6750_v46, %v731_v60  ;;  %v732_v9 = vmul.f32 %v6745_v44, %v636_v6  ;;  %5521 = vmatmul.mubr.bf16.gmra.mrb[36].mxu0 %v1008_v62 }
 0x11e   : > { %v804_v10 = vmax.f32 %v772_v3, 0.0  ;;  %v773_v11 = vadd.f32 %v6750_v46, %v734_v5  ;;  %5524 = vmatprep.mubr.bf16.mxu0 %v1009_v7  ;;  %5553 = vmatpush3.bf16.msra.mxu0 %v6338_v51  ;;  %v6348_v7 = vld [vmem:[%s7478_s4 + $0x78] sm:$0xff]  }
 0x11f   : > { %v802_v12 = vmax.f32 %v770_v8, 0.0  ;;  %v771_v13 = vadd.f32 %v6750_v46, %v732_v9  ;;  %5554 = vmatprep.subr.bf16.mxu0 %v6340_v0  ;;  %v953_v29 = vld [vmem:[#allocation2 + $0x90] sm:$0xff] }
 0x120   : > { %891 = vst [vmem:[#allocation2 + $0xc1] sm:$0xff] %v804_v10  ;;  %v805_v15 = vmax.f32 %v773_v11, 0.0  ;;  %v951_v21 = vld [vmem:[#allocation2 + $0x78] sm:$0xff] }
 0x121   : > { %889 = vst [vmem:[#allocation2 + $0xa9] sm:$0xff] %v802_v12  ;;  %v803_v16 = vmax.f32 %v771_v13, 0.0  ;;  %v5486_v17 = vpop.f32.mrb[16].mxu0  ;;  %v954_v18 = vld [vmem:[#allocation2 + $0x98] sm:$0xff] }
 0x122   : > { %892 = vst [vmem:[#allocation2 + $0xc9] sm:$0xff] %v805_v15  ;;  %v737_v19 = vmul.f32 %v5486_v17, %v6745_v44  ;;  %v649_v20 = vpop.f32.mrb[17].mxu0  ;;  %v952_v23 = vld [vmem:[#allocation2 + $0x80] sm:$0xff]  ;;  %5555 = vmatpush3.bf16.msra.mxu0 %v6340_v0  ;;  %v6810_v24 = vpack.c.bf16 %v805_v15, %v804_v10  ;;  %v1011_v47 = vpack.c.bf16 %v954_v18, %v953_v29 }
 0x123   : > { %890 = vst [vmem:[#allocation2 + $0xb1] sm:$0xff] %v803_v16  ;;  %v735_v25 = vmul.f32 %v6745_v44, %v649_v20  ;;  %v5487_v26 = vpop.f32.mrb[18].mxu0  ;;  %v1010_v27 = vpack.c.bf16 %v952_v23, %v951_v21  ;;  %5556 = vmatprep.subr.bf16.mxu0 %v6342_v14  ;;  %v6816_v31 = vpack.c.bf16 %v803_v16, %v802_v12 }
 0x124   : > { %v776_v32 = vadd.f32 %v6750_v46, %v737_v19  ;;  %v738_v33 = vmul.f32 %v5487_v26, %v6745_v44  ;;  %v652_v45 = vpop.f32.mrb[19].mxu0  ;;  %v6845_v19 = vld [vmem:[%s7478_s4 + $0x80] sm:$0xff]  }
 0x125   : > { %v774_v48 = vadd.f32 %v6750_v46, %v735_v25  ;;  %v736_v49 = vmul.f32 %v6745_v44, %v652_v45  ;;  %5525 = vmatmul.mubr.bf16.gmra.mrb[40].mxu0 %v1010_v27 }
 0x126   : > { %v808_v50 = vmax.f32 %v776_v32, 0.0  ;;  %v777_v51 = vadd.f32 %v6750_v46, %v738_v33  ;;  %5528 = vmatprep.mubr.bf16.mxu0 %v1011_v47  ;;  %5557 = vmatpush3.bf16.msra.mxu0 %v6342_v14 }
 0x127   : > { %v806_v52 = vmax.f32 %v774_v48, 0.0  ;;  %v775_v53 = vadd.f32 %v6750_v46, %v736_v49  ;;  %5558 = vmatprep.subr.bf16.mxu0 %v6344_v30  ;;  %v957_v6 = vld [vmem:[#allocation2 + $0xc0] sm:$0xff] }
 0x128   : > { %895 = vst [vmem:[#allocation2 + $0xf1] sm:$0xff] %v808_v50  ;;  %v809_v55 = vmax.f32 %v777_v51, 0.0  ;;  %v955_v61 = vld [vmem:[#allocation2 + $0xa8] sm:$0xff] }
 0x129   : > { %893 = vst [vmem:[#allocation2 + $0xd9] sm:$0xff] %v806_v52  ;;  %v807_v56 = vmax.f32 %v775_v53, 0.0  ;;  %v5490_v57 = vpop.f32.mrb[20].mxu0  ;;  %v958_v58 = vld [vmem:[#allocation2 + $0xc8] sm:$0xff] }
 0x12a   : > { %896 = vst [vmem:[#allocation2 + $0xf9] sm:$0xff] %v809_v55  ;;  %v741_v42 = vmul.f32 %v5490_v57, %v6745_v44  ;;  %v665_v60 = vpop.f32.mrb[21].mxu0  ;;  %v956_v62 = vld [vmem:[#allocation2 + $0xb0] sm:$0xff]  ;;  %5559 = vmatpush3.bf16.msra.mxu0 %v6344_v30  ;;  %v6828_v63 = vpack.c.bf16 %v809_v55, %v808_v50  ;;  %v1013_v12 = vpack.c.bf16 %v958_v58, %v957_v6 }
 0x12b   : > { %894 = vst [vmem:[#allocation2 + $0xe1] sm:$0xff] %v807_v56  ;;  %v739_v0 = vmul.f32 %v6745_v44, %v665_v60  ;;  %v5491_v3 = vpop.f32.mrb[22].mxu0  ;;  %v1012_v5 = vpack.c.bf16 %v956_v62, %v955_v61  ;;  %5560 = vmatprep.subr.bf16.mxu0 %v6346_v54  ;;  %v6834_v8 = vpack.c.bf16 %v807_v56, %v806_v52  ;;  %v6339_v62 = vld [vmem:[%s7478_s4 + $0x110] sm:$0xff]  }
 0x12c   : > { %v780_v9 = vadd.f32 %v6750_v46, %v741_v42  ;;  %v742_v10 = vmul.f32 %v5491_v3, %v6745_v44  ;;  %v668_v11 = vpop.f32.mrb[23].mxu0 }
 0x12d   : > { %v778_v13 = vadd.f32 %v6750_v46, %v739_v0  ;;  %v740_v14 = vmul.f32 %v6745_v44, %v668_v11  ;;  %5529 = vmatmul.mubr.bf16.gmra.mrb[44].mxu0 %v1012_v5 }
 0x12e   : > { %v812_v15 = vmax.f32 %v780_v9, 0.0  ;;  %v781_v16 = vadd.f32 %v6750_v46, %v742_v10  ;;  %5532 = vmatprep.mubr.bf16.mxu0 %v1013_v12  ;;  %5561 = vmatpush3.bf16.msra.mxu0 %v6346_v54  ;;  %v6337_v54 = vld [vmem:[%s7478_s4 + $0x108] sm:$0xff]  }
 0x12f   : > { %v810_v17 = vmax.f32 %v778_v13, 0.0  ;;  %v779_v18 = vadd.f32 %v6750_v46, %v740_v14  ;;  %5562 = vmatprep.subr.bf16.mxu0 %v6348_v7  ;;  %v961_v48 = vld [vmem:[#allocation2 + $0xf0] sm:$0xff] }
 0x130   : > { %899 = vst [vmem:[#allocation2 + $0x121] sm:$0xff] %v812_v15  ;;  %v813_v20 = vmax.f32 %v781_v16, 0.0  ;;  %v959_v29 = vld [vmem:[#allocation2 + $0xd8] sm:$0xff] }
 0x131   : > { %897 = vst [vmem:[#allocation2 + $0x109] sm:$0xff] %v810_v17  ;;  %v811_v21 = vmax.f32 %v779_v18, 0.0  ;;  %v5494_v23 = vpop.f32.mrb[24].mxu0  ;;  %v962_v25 = vld [vmem:[#allocation2 + $0xf8] sm:$0xff] }
 0x132   : > { %900 = vst [vmem:[#allocation2 + $0x129] sm:$0xff] %v813_v20  ;;  %v745_v26 = vmul.f32 %v5494_v23, %v6745_v44  ;;  %v681_v27 = vpop.f32.mrb[25].mxu0  ;;  %v960_v30 = vld [vmem:[#allocation2 + $0xe0] sm:$0xff]  ;;  %5563 = vmatpush3.bf16.msra.mxu0 %v6348_v7  ;;  %v6848_v32 = vpack.c.bf16 %v813_v20, %v812_v15  ;;  %v1015_v53 = vpack.c.bf16 %v962_v25, %v961_v48 }
 0x133   : > { %898 = vst [vmem:[#allocation2 + $0x111] sm:$0xff] %v811_v21  ;;  %v743_v33 = vmul.f32 %v6745_v44, %v681_v27  ;;  %v5495_v45 = vpop.f32.mrb[26].mxu0  ;;  %v1014_v47 = vpack.c.bf16 %v960_v30, %v959_v29  ;;  %5596 = vmatprep.subr.bf16.mxu0 %v6845_v19  ;;  %v6852_v49 = vpack.c.bf16 %v811_v21, %v810_v17  ;;  %v6341_v21 = vld [vmem:[%s7478_s4 + $0x118] sm:$0xff]  }
 0x134   : > { %v784_v50 = vadd.f32 %v6750_v46, %v745_v26  ;;  %v746_v51 = vmul.f32 %v5495_v45, %v6745_v44  ;;  %v684_v52 = vpop.f32.mrb[27].mxu0  ;;  %v6343_v45 = vld [vmem:[%s7478_s4 + $0x120] sm:$0xff]  }
 0x135   : > { %v782_v55 = vadd.f32 %v6750_v46, %v743_v33  ;;  %v744_v56 = vmul.f32 %v6745_v44, %v684_v52  ;;  %5533 = vmatmul.mubr.bf16.gmra.mrb[48].mxu0 %v1014_v47  ;;  %5676 = vmatprep.mubr.bf16.mxu1 %v1014_v47 }
 0x136   : > { %v816_v57 = vmax.f32 %v784_v50, 0.0  ;;  %v785_v58 = vadd.f32 %v6750_v46, %v746_v51  ;;  %5536 = vmatprep.mubr.bf16.mxu0 %v1015_v53  ;;  %5677 = vmatmul.mubr.bf16.vlgmr.msra.gmra.mrb[0].mxu1 %v1015_v53 }
 0x137   : > { %v814_v42 = vmax.f32 %v782_v55, 0.0  ;;  %v783_v60 = vadd.f32 %v6750_v46, %v744_v56  ;;  %5693 = vmatpush3.bf16.msra.mxu1 %v6738_v43  ;;  %v965_v14 = vld [vmem:[#allocation2 + $0x120] sm:$0xff]  ;;  %v6345_v55 = vld [vmem:[%s7478_s4 + $0x128] sm:$0xff]  }
 0x138   : > { %903 = vst [vmem:[#allocation2 + $0x151] sm:$0xff] %v816_v57  ;;  %v817_v61 = vmax.f32 %v785_v58, 0.0  ;;  %5694 = vmatprep.subr.bf16.mxu1 %v6337_v54  ;;  %v963_v9 = vld [vmem:[#allocation2 + $0x108] sm:$0xff]  ;;  %v6347_v58 = vld [vmem:[%s7478_s4 + $0x130] sm:$0xff]  }
 0x139   : > { %901 = vst [vmem:[#allocation2 + $0x139] sm:$0xff] %v814_v42  ;;  %v815_v0 = vmax.f32 %v783_v60, 0.0  ;;  %v5498_v3 = vpop.f32.mrb[28].mxu0  ;;  %v966_v5 = vld [vmem:[#allocation2 + $0x128] sm:$0xff] }
 0x13a   : > { %904 = vst [vmem:[#allocation2 + $0x159] sm:$0xff] %v817_v61  ;;  %v749_v6 = vmul.f32 %v5498_v3, %v6745_v44  ;;  %v697_v7 = vpop.f32.mrb[29].mxu0  ;;  %v964_v10 = vld [vmem:[#allocation2 + $0x110] sm:$0xff]  ;;  %v6868_v11 = vpack.c.bf16 %v817_v61, %v816_v57  ;;  %v1017_v20 = vpack.c.bf16 %v966_v5, %v965_v14  ;;  %v1310_v56 = vld [vmem:[#allocation2 + $0x1] sm:$0xff] }
 0x13b   : > { %902 = vst [vmem:[#allocation2 + $0x141] sm:$0xff] %v815_v0  ;;  %v747_v43 = vmul.f32 %v6745_v44, %v697_v7  ;;  %5695 = vmatpush3.bf16.msra.mxu1 %v6337_v54  ;;  %v5499_v12 = vpop.f32.mrb[30].mxu0  ;;  %v1016_v13 = vpack.c.bf16 %v964_v10, %v963_v9  ;;  %v6871_v15 = vpack.c.bf16 %v815_v0, %v814_v42  ;;  %v1311_v57 = vld [vmem:[#allocation2 + $0x9] sm:$0xff]  ;;  %v6350_v7 = vld [vmem:[%s7478_s4 + $0x140] sm:$0xff]  }
 0x13c   : > { %v788_v16 = vadd.f32 %v6750_v46, %v749_v6  ;;  %v750_v17 = vmul.f32 %v5499_v12, %v6745_v44  ;;  %v700_v18 = vpop.f32.mrb[31].mxu0  ;;  %5696 = vmatprep.subr.bf16.mxu1 %v6339_v62  ;;  %v6349_v6 = vld [vmem:[%s7478_s4 + $0x138] sm:$0xff]   ;;  %v6351_v9 = vld [vmem:[%s7478_s4 + $0x148] sm:$0xff]   ;;  %v6361_v14 = vld [vmem:[%s7478_s4 + $0x170] sm:$0xff]  }
 0x13d   : > { %v786_v23 = vadd.f32 %v6750_v46, %v747_v43  ;;  %v748_v25 = vmul.f32 %v6745_v44, %v700_v18  ;;  %5537 = vmatmul.mubr.bf16.gmra.mrb[52].mxu0 %v1016_v13  ;;  %5680 = vmatprep.mubr.bf16.mxu1 %v1016_v13  ;;  %v6356_v10 = vld [vmem:[%s7478_s4 + $0x88] sm:$0xff]   ;;  %v6352_v43 = vld [vmem:[%s7478_s4 + $0x150] sm:$0xff]   ;;  %v6359_v12 = vld [vmem:[%s7478_s4 + $0x98] sm:$0xff]  }
 0x13e   : > { %v820_v26 = vmax.f32 %v788_v16, 0.0  ;;  %v789_v27 = vadd.f32 %v6750_v46, %v750_v17  ;;  %5540 = vmatprep.mubr.bf16.mxu0 %v1017_v20  ;;  %5681 = vmatmul.mubr.bf16.gmra.mrb[4].mxu1 %v1017_v20  ;;  %v6362_v13 = vld [vmem:[%s7478_s4 + $0xa8] sm:$0xff]   ;;  %v6365_v16 = vld [vmem:[%s7478_s4 + $0xb8] sm:$0xff]   ;;  %v6366_v17 = vld [vmem:[%s7478_s4 + $0x180] sm:$0xff]  }
 0x13f   : > { %v818_v29 = vmax.f32 %v786_v23, 0.0  ;;  %v787_v30 = vadd.f32 %v6750_v46, %v748_v25  ;;  %5697 = vmatpush3.bf16.msra.mxu1 %v6339_v62  ;;  %v969_v46 = vld [vmem:[#allocation2 + $0x150] sm:$0xff]  ;;  %v1374_v62 = vpack.c.bf16 %v1311_v57, %v1310_v56  ;;  %v2807_v56 = vld [vmem:[#allocation2 + $0xe2] sm:$0xff] }
 0x140   : > { %907 = vst [vmem:[#allocation2 + $0x181] sm:$0xff] %v820_v26  ;;  %v821_v33 = vmax.f32 %v789_v27, 0.0  ;;  %5698 = vmatprep.subr.bf16.mxu1 %v6341_v21  ;;  %v967_v48 = vld [vmem:[#allocation2 + $0x138] sm:$0xff]  ;;  %v2794_v20 = vld [vmem:[#allocation2 + $0x4a] sm:$0xff]  ;;  %v1688_v27 = vld [vmem:[#allocation2 + $0x62] sm:$0xff] }
 0x141   : > { %905 = vst [vmem:[#allocation2 + $0x169] sm:$0xff] %v818_v29  ;;  %v819_v44 = vmax.f32 %v787_v30, 0.0  ;;  %v970_v47 = vld [vmem:[#allocation2 + $0x158] sm:$0xff] }
 0x142   : > { %908 = vst [vmem:[#allocation2 + $0x189] sm:$0xff] %v821_v33  ;;  %v968_v50 = vld [vmem:[#allocation2 + $0x140] sm:$0xff]  ;;  %v6885_v51 = vpack.c.bf16 %v821_v33, %v820_v26  ;;  %v1019_v54 = vpack.c.bf16 %v970_v47, %v969_v46  ;;  %v6368_v26 = vld [vmem:[%s7478_s4 + $0x190] sm:$0xff]   ;;  %v6371_v46 = vld [vmem:[%s7478_s4 + $0x1a8] sm:$0xff]  }
 0x143   : > { %906 = vst [vmem:[#allocation2 + $0x171] sm:$0xff] %v819_v44  ;;  %5699 = vmatpush3.bf16.msra.mxu1 %v6341_v21  ;;  %v1018_v52 = vpack.c.bf16 %v968_v50, %v967_v48  ;;  %v6887_v53 = vpack.c.bf16 %v819_v44, %v818_v29  ;;  %v2795_v21 = vld [vmem:[#allocation2 + $0x52] sm:$0xff]  ;;  %v1689_v29 = vld [vmem:[#allocation2 + $0x6a] sm:$0xff]  ;;  %v2798_v30 = vld [vmem:[#allocation2 + $0x7a] sm:$0xff] }
 0x144   : > { %5700 = vmatprep.subr.bf16.mxu1 %v6343_v45  ;;  %v6984_v25 = vpack.c.bf16 %v2795_v21, %v2794_v20  ;;  %v2799_v33 = vld [vmem:[#allocation2 + $0x82] sm:$0xff]  ;;  %v6369_v44 = vld [vmem:[%s7478_s4 + $0x198] sm:$0xff]   ;;  %v2802_v50 = vld [vmem:[#allocation2 + $0xaa] sm:$0xff] }
 0x145   : > { %5541 = vmatmul.mubr.bf16.gmra.mrb[56].mxu0 %v1018_v52  ;;  %5684 = vmatprep.mubr.bf16.mxu1 %v1018_v52  ;;  %v7001_v47 = vpack.c.bf16 %v2799_v33, %v2798_v30  ;;  %v1693_v48 = vld [vmem:[#allocation2 + $0x9a] sm:$0xff]  ;;  %v6376_v20 = vld [vmem:[%s7478_s4 + $0x1d0] sm:$0xff]  }
 0x146   : > { %5544 = vmatprep.mubr.bf16.mxu0 %v1019_v54  ;;  %5685 = vmatmul.mubr.bf16.gmra.mrb[8].mxu1 %v1019_v54  ;;  %v1697_v54 = vld [vmem:[#allocation2 + $0xca] sm:$0xff]  ;;  %v2059_v21 = vld [vmem:[#allocation2 + $0x80] sm:$0xff]  ;;  %v6377_v30 = vld [vmem:[%s7478_s4 + $0x1d8] sm:$0xff]  }
 0x147   : > { %5701 = vmatpush3.bf16.msra.mxu1 %v6343_v45  ;;  %v2080_v3 = vld [vmem:[#allocation2 + $0x180] sm:$0xff]  ;;  %v6994_v45 = vpack.c.bf16 %v1689_v29, %v1688_v27  ;;  %v3169_v29 = vld [vmem:[#allocation2 + $0x90] sm:$0xff] }
 0x148   : > { %5702 = vmatprep.subr.bf16.mxu1 %v6345_v55  ;;  %v971_v60 = vld [vmem:[#allocation2 + $0x168] sm:$0xff] }
 0x149   : > { %v2081_v42 = vld [vmem:[#allocation2 + $0x188] sm:$0xff] }
 0x14a   : > { %v972_v61 = vld [vmem:[#allocation2 + $0x170] sm:$0xff]  ;;  %v2129_v5 = vpack.c.bf16 %v2081_v42, %v2080_v3 }
 0x14b   : > { %5703 = vmatpush3.bf16.msra.mxu1 %v6345_v55  ;;  %v1020_v0 = vpack.c.bf16 %v972_v61, %v971_v60  ;;  %v2806_v55 = vld [vmem:[#allocation2 + $0xda] sm:$0xff]  ;;  %v2810_v61 = vld [vmem:[#allocation2 + $0x10a] sm:$0xff] }
 0x14c   : > { %5704 = vmatprep.subr.bf16.mxu1 %v6347_v58  ;;  %v7037_v42 = vpack.c.bf16 %v2807_v56, %v2806_v55  ;;  %v1701_v60 = vld [vmem:[#allocation2 + $0xfa] sm:$0xff] }
 0x14d   : > { %5545 = vmatmul.mubr.bf16.gmra.mrb[60].mxu0 %v1020_v0  ;;  %5688 = vmatprep.mubr.bf16.mxu1 %v1020_v0  ;;  %v3178_v55 = vld [vmem:[#allocation2 + $0xf8] sm:$0xff] }
 0x14e   : > { %5689 = vmatmul.mubr.bf16.gmra.mrb[12].mxu1 %v2129_v5  ;;  %5564 = vmatprep.mubr.bf16.mxu0 %v1374_v62  ;;  %v2811_v62 = vld [vmem:[#allocation2 + $0x112] sm:$0xff]  ;;  %v1705_v5 = vld [vmem:[#allocation2 + $0x12a] sm:$0xff] }
 0x14f   : > { %5705 = vmatpush3.bf16.msra.mxu1 %v6347_v58  ;;  %5708 = vmatprep.mubr.bf16.mxu1 %v6764_v4  ;;  %v6373_v58 = vld [vmem:[%s7478_s4 + $0x1b8] sm:$0xff]   ;;  %v7052_v3 = vpack.c.bf16 %v2811_v62, %v2810_v61  ;;  %v6382_v61 = vld [vmem:[%s7478_s4 + $0x200] sm:$0xff]   ;;  %v3180_v62 = vld [vmem:[#allocation2 + $0x110] sm:$0xff] }
 0x150   : > { %5706 = vmatprep.subr.bf16.mxu1 %v6349_v6  ;;  %v3175_v56 = vld [vmem:[#allocation2 + $0xd8] sm:$0xff] }
 0x153   : > { %5707 = vmatpush3.bf16.msra.mxu1 %v6349_v6  ;;  %v2814_v6 = vld [vmem:[#allocation2 + $0x13a] sm:$0xff] }
 0x154   : > { %5740 = vmatprep.subr.bf16.mxu1 %v6350_v7 }
 0x155   : > { %5565 = vmatmul.mubr.bf16.vlgmr.msra.gmra.mrb[32].mxu0 %v6764_v4  ;;  %v6357_v4 = vld [vmem:[%s7478_s4 + $0x90] sm:$0xff]  }
 0x156   : > { %5568 = vmatprep.mubr.bf16.mxu0 %v6761_v1  ;;  %5709 = vmatmul.mubr.bf16.vlgmr.msra.gmra.mrb[16].mxu1 %v6761_v1  ;;  %v6353_v1 = vld [vmem:[%s7478_s4 + $0x158] sm:$0xff]  }
 0x157   : > { %5741 = vmatpush3.bf16.msra.mxu1 %v6350_v7  ;;  %5712 = vmatprep.mubr.bf16.mxu1 %v6779_v28  ;;  %v2815_v7 = vld [vmem:[#allocation2 + $0x142] sm:$0xff] }
 0x158   : > { %5742 = vmatprep.subr.bf16.mxu1 %v6351_v9  ;;  %5597 = vmatpush3.bf16.msra.mxu0 %v6845_v19  ;;  %v6355_v19 = vld [vmem:[%s7478_s4 + $0x160] sm:$0xff]  }
 0x159   : > { %5598 = vmatprep.subr.bf16.mxu0 %v6356_v10 }
 0x15b   : > { %5743 = vmatpush3.bf16.msra.mxu1 %v6351_v9 }
 0x15c   : > { %5744 = vmatprep.subr.bf16.mxu1 %v6352_v43  ;;  %5599 = vmatpush3.bf16.msra.mxu0 %v6356_v10  ;;  %v1708_v10 = vld [vmem:[#allocation2 + $0x152] sm:$0xff] }
 0x15d   : > { %5569 = vmatmul.mubr.bf16.gmra.mrb[36].mxu0 %v6779_v28  ;;  %5600 = vmatprep.subr.bf16.mxu0 %v6357_v4  ;;  %v6360_v28 = vld [vmem:[%s7478_s4 + $0xa0] sm:$0xff]  }
 0x15e   : > { %5572 = vmatprep.mubr.bf16.mxu0 %v6773_v22  ;;  %5713 = vmatmul.mubr.bf16.gmra.mrb[20].mxu1 %v6773_v22  ;;  %v6358_v22 = vld [vmem:[%s7478_s4 + $0x168] sm:$0xff]  }
 0x15f   : > { %5716 = vmatprep.mubr.bf16.mxu1 %v6798_v2  ;;  %5745 = vmatpush3.bf16.msra.mxu1 %v6352_v43  ;;  %v1709_v43 = vld [vmem:[#allocation2 + $0x15a] sm:$0xff] }
 0x160   : > { %5746 = vmatprep.subr.bf16.mxu1 %v6353_v1  ;;  %5601 = vmatpush3.bf16.msra.mxu0 %v6357_v4  ;;  %v2818_v4 = vld [vmem:[#allocation2 + $0x16a] sm:$0xff] }
 0x161   : > { %5602 = vmatprep.subr.bf16.mxu0 %v6359_v12 }
 0x163   : > { %5747 = vmatpush3.bf16.msra.mxu1 %v6353_v1  ;;  %v2819_v1 = vld [vmem:[#allocation2 + $0x172] sm:$0xff] }
 0x164   : > { %5748 = vmatprep.subr.bf16.mxu1 %v6355_v19  ;;  %5603 = vmatpush3.bf16.msra.mxu0 %v6359_v12  ;;  %v7065_v12 = vpack.c.bf16 %v1709_v43, %v1708_v10  ;;  %v3184_v43 = vld [vmem:[#allocation2 + $0x140] sm:$0xff] }
 0x165   : > { %5573 = vmatmul.mubr.bf16.gmra.mrb[40].mxu0 %v6798_v2  ;;  %5604 = vmatprep.subr.bf16.mxu0 %v6360_v28  ;;  %v6363_v2 = vld [vmem:[%s7478_s4 + $0xb0] sm:$0xff]  }
 0x166   : > { %5576 = vmatprep.mubr.bf16.mxu0 %v6792_v59  ;;  %5717 = vmatmul.mubr.bf16.gmra.mrb[24].mxu1 %v6792_v59  ;;  %v6364_v59 = vld [vmem:[%s7478_s4 + $0x178] sm:$0xff]  }
 0x167   : > { %5720 = vmatprep.mubr.bf16.mxu1 %v6816_v31  ;;  %5749 = vmatpush3.bf16.msra.mxu1 %v6355_v19  ;;  %v7068_v19 = vpack.c.bf16 %v2819_v1, %v2818_v4  ;;  %v3186_v4 = vld [vmem:[#allocation2 + $0x158] sm:$0xff] }
 0x168   : > { %5750 = vmatprep.subr.bf16.mxu1 %v6358_v22  ;;  %5605 = vmatpush3.bf16.msra.mxu0 %v6360_v28  ;;  %v2051_v28 = vld [vmem:[#allocation2 + $0x20] sm:$0xff]  ;;  %v3183_v1 = vld [vmem:[#allocation2 + $0x138] sm:$0xff] }
 0x169   : > { %5606 = vmatprep.subr.bf16.mxu0 %v6362_v13 }
 0x16b   : > { %5751 = vmatpush3.bf16.msra.mxu1 %v6358_v22  ;;  %v2820_v22 = vld [vmem:[#allocation2 + $0x182] sm:$0xff] }
 0x16c   : > { %5752 = vmatprep.subr.bf16.mxu1 %v6361_v14  ;;  %5607 = vmatpush3.bf16.msra.mxu0 %v6362_v13  ;;  %v2821_v13 = vld [vmem:[#allocation2 + $0x18a] sm:$0xff] }
 0x16d   : > { %5577 = vmatmul.mubr.bf16.gmra.mrb[44].mxu0 %v6816_v31  ;;  %5608 = vmatprep.subr.bf16.mxu0 %v6363_v2  ;;  %v1681_v31 = vld [vmem:[#allocation2 + $0xa] sm:$0xff] }
 0x16e   : > { %5580 = vmatprep.mubr.bf16.mxu0 %v6810_v24  ;;  %5721 = vmatmul.mubr.bf16.gmra.mrb[28].mxu1 %v6810_v24  ;;  %v1680_v24 = vld [vmem:[#allocation2 + $0x2] sm:$0xff] }
 0x16f   : > { %5724 = vmatprep.mubr.bf16.mxu1 %v6834_v8  ;;  %5753 = vmatpush3.bf16.msra.mxu1 %v6361_v14  ;;  %v1744_v18 = vpack.c.bf16 %v1681_v31, %v1680_v24  ;;  %v3162_v14 = vld [vmem:[#allocation2 + $0x38] sm:$0xff]  ;;  %v2055_v31 = vld [vmem:[#allocation2 + $0x50] sm:$0xff] }
 0x170   : > { %5754 = vmatprep.subr.bf16.mxu1 %v6364_v59  ;;  %5609 = vmatpush3.bf16.msra.mxu0 %v6363_v2  ;;  %v2050_v2 = vld [vmem:[#allocation2 + $0x18] sm:$0xff] }
 0x171   : > { %5610 = vmatprep.subr.bf16.mxu0 %v6365_v16 }
 0x173   : > { %5755 = vmatpush3.bf16.msra.mxu1 %v6364_v59  ;;  %v2114_v59 = vpack.c.bf16 %v2051_v28, %v2050_v2  ;;  %v3236_v28 = vpack.c.bf16 %v3184_v43, %v3183_v1  ;;  %v3190_v2 = vld [vmem:[#allocation2 + $0x188] sm:$0xff] }
 0x174   : > { %5611 = vmatpush3.bf16.msra.mxu0 %v6365_v16  ;;  %5788 = vmatprep.subr.bf16.mxu1 %v6366_v17  ;;  %v7073_v16 = vpack.c.bf16 %v2821_v13, %v2820_v22  ;;  %v3185_v22 = vld [vmem:[#allocation2 + $0x150] sm:$0xff] }
 0x175   : > { %5581 = vmatmul.mubr.bf16.gmra.mrb[48].mxu0 %v6834_v8  ;;  %5644 = vmatprep.subr.bf16.mxu0 %v6677_v34  ;;  %v2791_v8 = vld [vmem:[#allocation2 + $0x22] sm:$0xff]  ;;  %v3237_v13 = vpack.c.bf16 %v3186_v4, %v3185_v22 }
 0x176   : > { %5584 = vmatprep.mubr.bf16.mxu0 %v6828_v63  ;;  %5725 = vmatmul.mubr.bf16.gmra.mrb[0].mxu1 %v6828_v63  ;;  %v2790_v63 = vld [vmem:[#allocation2 + $0x1a] sm:$0xff]  ;;  %v3552_v43 = vld [vmem:[#allocation2 + $0x129] sm:$0xff] }
 0x177   : > { %5728 = vmatprep.mubr.bf16.mxu1 %v6852_v49  ;;  %v3549_v4 = vld [vmem:[#allocation2 + $0x109] sm:$0xff] }
 0x17d   : > { %5585 = vmatmul.mubr.bf16.gmra.mrb[52].mxu0 %v6852_v49  ;;  %v2854_v49 = vpack.c.bf16 %v2791_v8, %v2790_v63  ;;  %v3166_v63 = vld [vmem:[#allocation2 + $0x68] sm:$0xff] }
 0x17e   : > { %5588 = vmatprep.mubr.bf16.mxu0 %v6848_v32  ;;  %5729 = vmatmul.mubr.bf16.gmra.mrb[4].mxu1 %v6848_v32  ;;  %v1684_v32 = vld [vmem:[#allocation2 + $0x32] sm:$0xff]  ;;  %v2054_v8 = vld [vmem:[#allocation2 + $0x48] sm:$0xff] }
 0x17f   : > { %5732 = vmatprep.mubr.bf16.mxu1 %v6871_v15 }
 0x185   : > { %5589 = vmatmul.mubr.bf16.gmra.mrb[56].mxu0 %v6871_v15  ;;  %v1685_v15 = vld [vmem:[#allocation2 + $0x3a] sm:$0xff] }
 0x186   : > { %5592 = vmatprep.mubr.bf16.mxu0 %v6868_v11  ;;  %5733 = vmatmul.mubr.bf16.gmra.mrb[8].mxu1 %v6868_v11  ;;  %v6979_v23 = vpack.c.bf16 %v1685_v15, %v1684_v32  ;;  %v6367_v11 = vld [vmem:[%s7478_s4 + $0x188] sm:$0xff]  }
 0x187   : > { %5736 = vmatprep.mubr.bf16.mxu1 %v6887_v53  ;;  %v6375_v32 = vld [vmem:[%s7478_s4 + $0x1c8] sm:$0xff]  }
 0x18d   : > { %5593 = vmatmul.mubr.bf16.gmra.mrb[60].mxu0 %v6887_v53 }
 0x18e   : > { %5737 = vmatmul.mubr.bf16.gmra.mrb[12].mxu1 %v6885_v51  ;;  %5612 = vmatprep.mubr.bf16.mxu0 %v1744_v18  ;;  %v2803_v51 = vld [vmem:[#allocation2 + $0xb2] sm:$0xff]  ;;  %v2116_v18 = vpack.c.bf16 %v2055_v31, %v2054_v8 }
 0x18f   : > { %5756 = vmatprep.mubr.bf16.mxu1 %v2854_v49  ;;  %v7019_v53 = vpack.c.bf16 %v2803_v51, %v2802_v50  ;;  %v3173_v51 = vld [vmem:[#allocation2 + $0xc0] sm:$0xff] }
 0x195   : > { %5613 = vmatmul.mubr.bf16.vlgmr.msra.gmra.mrb[32].mxu0 %v2854_v49  ;;  %v3165_v49 = vld [vmem:[#allocation2 + $0x60] sm:$0xff] }
 0x196   : > { %5616 = vmatprep.mubr.bf16.mxu0 %v6979_v23  ;;  %5757 = vmatmul.mubr.bf16.vlgmr.msra.gmra.mrb[16].mxu1 %v6979_v23  ;;  %v3227_v15 = vpack.c.bf16 %v3166_v63, %v3165_v49  ;;  %v6414_v63 = vld [vmem:[#allocation2] sm:$0xff]  ;;  %v3531_v49 = vld [vmem:[#allocation2 + $0x31] sm:$0xff] }
 0x197   : > { %5789 = vmatpush3.bf16.msra.mxu1 %v6366_v17  ;;  %5760 = vmatprep.mubr.bf16.mxu1 %v6984_v25  ;;  %v3161_v17 = vld [vmem:[#allocation2 + $0x30] sm:$0xff]  ;;  %v3240_v8 = vpack.c.bf16 %v6414_v63, %v6414_v63 }
 0x198   : > { %5790 = vmatprep.subr.bf16.mxu1 %v6367_v11  ;;  %5645 = vmatpush3.bf16.msra.mxu0 %v6677_v34  ;;  %v6370_v34 = vld [vmem:[%s7478_s4 + $0x1a0] sm:$0xff]   ;;  %v3225_v24 = vpack.c.bf16 %v3162_v14, %v3161_v17  ;;  %v3188_v14 = vld [vmem:[#allocation2 + $0x170] sm:$0xff] }
 0x199   : > { %5646 = vmatprep.subr.bf16.mxu0 %v6684_v35  ;;  %v3560_v63 = vld [vmem:[#allocation2 + $0x189] sm:$0xff] }
 0x19b   : > { %5791 = vmatpush3.bf16.msra.mxu1 %v6367_v11  ;;  %v3170_v11 = vld [vmem:[#allocation2 + $0x98] sm:$0xff] }
 0x19c   : > { %5792 = vmatprep.subr.bf16.mxu1 %v6368_v26  ;;  %5647 = vmatpush3.bf16.msra.mxu0 %v6684_v35  ;;  %v1692_v35 = vld [vmem:[#allocation2 + $0x92] sm:$0xff]  ;;  %v3229_v33 = vpack.c.bf16 %v3170_v11, %v3169_v29 }
 0x19d   : > { %5617 = vmatmul.mubr.bf16.gmra.mrb[36].mxu0 %v6984_v25  ;;  %5648 = vmatprep.subr.bf16.mxu0 %v6691_v36  ;;  %v7012_v52 = vpack.c.bf16 %v1693_v48, %v1692_v35  ;;  %v3174_v35 = vld [vmem:[#allocation2 + $0xc8] sm:$0xff] }
 0x19e   : > { %5620 = vmatprep.mubr.bf16.mxu0 %v6994_v45  ;;  %5761 = vmatmul.mubr.bf16.gmra.mrb[20].mxu1 %v6994_v45  ;;  %v2062_v48 = vld [vmem:[#allocation2 + $0xa8] sm:$0xff] }
 0x19f   : > { %5764 = vmatprep.mubr.bf16.mxu1 %v7001_v47  ;;  %5793 = vmatpush3.bf16.msra.mxu1 %v6368_v26  ;;  %v2058_v26 = vld [vmem:[#allocation2 + $0x78] sm:$0xff] }
 0x1a0   : > { %5794 = vmatprep.subr.bf16.mxu1 %v6369_v44  ;;  %5649 = vmatpush3.bf16.msra.mxu0 %v6691_v36  ;;  %v6372_v36 = vld [vmem:[%s7478_s4 + $0x1b0] sm:$0xff]   ;;  %v2118_v27 = vpack.c.bf16 %v2059_v21, %v2058_v26  ;;  %v3535_v26 = vld [vmem:[#allocation2 + $0x61] sm:$0xff] }
 0x1a1   : > { %5650 = vmatprep.subr.bf16.mxu0 %v6698_v37  ;;  %v3533_v21 = vld [vmem:[#allocation2 + $0x49] sm:$0xff] }
 0x1a3   : > { %5795 = vmatpush3.bf16.msra.mxu1 %v6369_v44  ;;  %v6378_v44 = vld [vmem:[%s7478_s4 + $0x1e0] sm:$0xff]  }
 0x1a4   : > { %5796 = vmatprep.subr.bf16.mxu1 %v6370_v34  ;;  %5651 = vmatpush3.bf16.msra.mxu0 %v6698_v37  ;;  %v1696_v37 = vld [vmem:[#allocation2 + $0xc2] sm:$0xff] }
 0x1a5   : > { %5621 = vmatmul.mubr.bf16.gmra.mrb[40].mxu0 %v7001_v47  ;;  %5652 = vmatprep.subr.bf16.mxu0 %v6705_v38  ;;  %v7030_v57 = vpack.c.bf16 %v1697_v54, %v1696_v37  ;;  %v6380_v37 = vld [vmem:[%s7478_s4 + $0x1f0] sm:$0xff]   ;;  %v3176_v54 = vld [vmem:[#allocation2 + $0xe0] sm:$0xff] }
 0x1a6   : > { %5624 = vmatprep.mubr.bf16.mxu0 %v7012_v52  ;;  %5765 = vmatmul.mubr.bf16.gmra.mrb[24].mxu1 %v7012_v52 }
 0x1a7   : > { %5768 = vmatprep.mubr.bf16.mxu1 %v7019_v53  ;;  %5797 = vmatpush3.bf16.msra.mxu1 %v6370_v34  ;;  %v2063_v34 = vld [vmem:[#allocation2 + $0xb0] sm:$0xff] }
 0x1a8   : > { %5798 = vmatprep.subr.bf16.mxu1 %v6371_v46  ;;  %5653 = vmatpush3.bf16.msra.mxu0 %v6705_v38  ;;  %v6374_v38 = vld [vmem:[%s7478_s4 + $0x1c0] sm:$0xff]   ;;  %v2120_v50 = vpack.c.bf16 %v2063_v34, %v2062_v48  ;;  %v3539_v48 = vld [vmem:[#allocation2 + $0x91] sm:$0xff] }
 0x1a9   : > { %5654 = vmatprep.subr.bf16.mxu0 %v6712_v39  ;;  %v3537_v34 = vld [vmem:[#allocation2 + $0x79] sm:$0xff] }
 0x1ab   : > { %5799 = vmatpush3.bf16.msra.mxu1 %v6371_v46  ;;  %v6379_v46 = vld [vmem:[%s7478_s4 + $0x1e8] sm:$0xff]  }
 0x1ac   : > { %5800 = vmatprep.subr.bf16.mxu1 %v6372_v36  ;;  %5655 = vmatpush3.bf16.msra.mxu0 %v6712_v39  ;;  %v1700_v39 = vld [vmem:[#allocation2 + $0xf2] sm:$0xff] }
 0x1ad   : > { %5625 = vmatmul.mubr.bf16.gmra.mrb[44].mxu0 %v7019_v53  ;;  %5656 = vmatprep.subr.bf16.mxu0 %v6719_v40  ;;  %v7048_v0 = vpack.c.bf16 %v1701_v60, %v1700_v39  ;;  %v6381_v39 = vld [vmem:[%s7478_s4 + $0x1f8] sm:$0xff]  }
 0x1ae   : > { %5628 = vmatprep.mubr.bf16.mxu0 %v7030_v57  ;;  %5769 = vmatmul.mubr.bf16.gmra.mrb[28].mxu1 %v7030_v57 }
 0x1af   : > { %5772 = vmatprep.mubr.bf16.mxu1 %v7037_v42  ;;  %5801 = vmatpush3.bf16.msra.mxu1 %v6372_v36  ;;  %v3231_v36 = vpack.c.bf16 %v3174_v35, %v3173_v51 }
 0x1b0   : > { %5802 = vmatprep.subr.bf16.mxu1 %v6373_v58  ;;  %5657 = vmatpush3.bf16.msra.mxu0 %v6719_v40  ;;  %v1704_v40 = vld [vmem:[#allocation2 + $0x122] sm:$0xff] }
 0x1b1   : > { %5658 = vmatprep.subr.bf16.mxu0 %v6726_v41  ;;  %v7057_v9 = vpack.c.bf16 %v1705_v5, %v1704_v40  ;;  %v3182_v40 = vld [vmem:[#allocation2 + $0x128] sm:$0xff] }
 0x1b2   : > { %v3179_v5 = vld [vmem:[#allocation2 + $0x108] sm:$0xff] }
 0x1b3   : > { %5803 = vmatpush3.bf16.msra.mxu1 %v6373_v58  ;;  %v3232_v58 = vpack.c.bf16 %v3176_v54, %v3175_v56  ;;  %v3541_v54 = vld [vmem:[#allocation2 + $0xa9] sm:$0xff]  ;;  %v3543_v56 = vld [vmem:[#allocation2 + $0xc1] sm:$0xff] }
 0x1b4   : > { %5659 = vmatpush3.bf16.msra.mxu0 %v6726_v41  ;;  %5836 = vmatprep.subr.bf16.mxu1 %v6374_v38  ;;  %v7060_v41 = vpack.c.bf16 %v2815_v7, %v2814_v6  ;;  %v3234_v6 = vpack.c.bf16 %v3180_v62, %v3179_v5  ;;  %v3181_v7 = vld [vmem:[#allocation2 + $0x120] sm:$0xff]  ;;  %v3547_v5 = vld [vmem:[#allocation2 + $0xf1] sm:$0xff] }
 0x1b5   : > { %5629 = vmatmul.mubr.bf16.gmra.mrb[48].mxu0 %v7037_v42  ;;  %v3235_v10 = vpack.c.bf16 %v3182_v40, %v3181_v7  ;;  %v3545_v62 = vld [vmem:[#allocation2 + $0xd9] sm:$0xff] }
 0x1b6   : > { %5632 = vmatprep.mubr.bf16.mxu0 %v7048_v0  ;;  %5773 = vmatmul.mubr.bf16.gmra.mrb[0].mxu1 %v7048_v0 }
 0x1b7   : > { %5776 = vmatprep.mubr.bf16.mxu1 %v7052_v3 }
 0x1bd   : > { %5633 = vmatmul.mubr.bf16.gmra.mrb[52].mxu0 %v7052_v3 }
 0x1be   : > { %5636 = vmatprep.mubr.bf16.mxu0 %v7057_v9  ;;  %5777 = vmatmul.mubr.bf16.gmra.mrb[4].mxu1 %v7057_v9 }
 0x1bf   : > { %5780 = vmatprep.mubr.bf16.mxu1 %v7060_v41 }
 0x1c5   : > { %5637 = vmatmul.mubr.bf16.gmra.mrb[56].mxu0 %v7060_v41 }
 0x1c6   : > { %5640 = vmatprep.mubr.bf16.mxu0 %v7065_v12  ;;  %5781 = vmatmul.mubr.bf16.gmra.mrb[8].mxu1 %v7065_v12 }
 0x1c7   : > { %5784 = vmatprep.mubr.bf16.mxu1 %v7068_v19 }
 0x1cd   : > { %5641 = vmatmul.mubr.bf16.gmra.mrb[60].mxu0 %v7068_v19 }
 0x1ce   : > { %5660 = vmatprep.mubr.bf16.mxu0 %v2114_v59  ;;  %5785 = vmatmul.mubr.bf16.gmra.mrb[12].mxu1 %v7073_v16  ;;  %v3187_v59 = vld [vmem:[#allocation2 + $0x168] sm:$0xff] }
 0x1cf   : > { %5804 = vmatprep.mubr.bf16.mxu1 %v3225_v24  ;;  %v3238_v17 = vpack.c.bf16 %v3188_v14, %v3187_v59  ;;  %v3556_v14 = vld [vmem:[#allocation2 + $0x159] sm:$0xff] }
 0x1d5   : > { %5661 = vmatmul.mubr.bf16.vlgmr.msra.gmra.mrb[32].mxu0 %v3225_v24  ;;  %v3189_v24 = vld [vmem:[#allocation2 + $0x180] sm:$0xff] }
 0x1d6   : > { %5664 = vmatprep.mubr.bf16.mxu0 %v2116_v18  ;;  %5805 = vmatmul.mubr.bf16.vlgmr.msra.gmra.mrb[16].mxu1 %v2116_v18  ;;  %v3239_v31 = vpack.c.bf16 %v3190_v2, %v3189_v24  ;;  %v3532_v18 = vld [vmem:[#allocation2 + $0x39] sm:$0xff] }
 0x1d7   : > { %5837 = vmatpush3.bf16.msra.mxu1 %v6374_v38  ;;  %5808 = vmatprep.mubr.bf16.mxu1 %v3227_v15  ;;  %v3177_v38 = vld [vmem:[#allocation2 + $0xf0] sm:$0xff]  ;;  %v3553_v2 = vld [vmem:[#allocation2 + $0x139] sm:$0xff] }
 0x1d8   : > { %5838 = vmatprep.subr.bf16.mxu1 %v6375_v32  ;;  %v3233_v60 = vpack.c.bf16 %v3178_v55, %v3177_v38 }
 0x1db   : > { %5839 = vmatpush3.bf16.msra.mxu1 %v6375_v32  ;;  %v3595_v32 = vpack.c.bf16 %v3532_v18, %v3531_v49  ;;  %v6390_v18 = vld [vmem:[%s7481_s7] sm:$0xff]   ;;  %v6391_v49 = vld [vmem:[%s7481_s7 + $0x8] sm:$0xff]  }
 0x1dc   : > { %5840 = vmatprep.subr.bf16.mxu1 %v6376_v20  ;;  %5932 = vmatprep.subr.bf16.mxu0 %v6390_v18 }
 0x1dd   : > { %5665 = vmatmul.mubr.bf16.gmra.mrb[36].mxu0 %v3227_v15  ;;  %v3534_v15 = vld [vmem:[#allocation2 + $0x51] sm:$0xff] }
 0x1de   : > { %5668 = vmatprep.mubr.bf16.mxu0 %v2118_v27  ;;  %5809 = vmatmul.mubr.bf16.gmra.mrb[20].mxu1 %v2118_v27  ;;  %v3596_v11 = vpack.c.bf16 %v3534_v15, %v3533_v21  ;;  %v6383_v27 = vld [vmem:[%s7478_s4 + $0x208] sm:$0xff]   ;;  %v3561_v21 = vld [vmem:[#allocation2 + $0x199] sm:$0xff] }
 0x1df   : > { %5812 = vmatprep.mubr.bf16.mxu1 %v3229_v33  ;;  %5841 = vmatpush3.bf16.msra.mxu1 %v6376_v20  ;;  %v3536_v20 = vld [vmem:[#allocation2 + $0x69] sm:$0xff]  ;;  %v3559_v15 = vld [vmem:[#allocation2 + $0x181] sm:$0xff] }
 0x1e0   : > { %5842 = vmatprep.subr.bf16.mxu1 %v6377_v30  ;;  %v3597_v29 = vpack.c.bf16 %v3536_v20, %v3535_v26  ;;  %v3609_v20 = vpack.c.bf16 %v3560_v63, %v3559_v15  ;;  %5933 = vmatpush3.bf16.msra.mxu0 %v6390_v18  ;;  %v6392_v26 = vld [vmem:[%s7481_s7 + $0x10] sm:$0xff]  }
 0x1e1   : > { %5934 = vmatprep.subr.bf16.mxu0 %v6391_v49 }
 0x1e3   : > { %5843 = vmatpush3.bf16.msra.mxu1 %v6377_v30  ;;  %v6384_v30 = vld [vmem:[%s7478_s4 + $0x210] sm:$0xff]  }
 0x1e4   : > { %5844 = vmatprep.subr.bf16.mxu1 %v6378_v44  ;;  %5935 = vmatpush3.bf16.msra.mxu0 %v6391_v49 }
 0x1e5   : > { %5669 = vmatmul.mubr.bf16.gmra.mrb[40].mxu0 %v3229_v33  ;;  %v3538_v33 = vld [vmem:[#allocation2 + $0x81] sm:$0xff]  ;;  %5936 = vmatprep.subr.bf16.mxu0 %v6392_v26 }
 0x1e6   : > { %5672 = vmatprep.mubr.bf16.mxu0 %v2120_v50  ;;  %5813 = vmatmul.mubr.bf16.gmra.mrb[24].mxu1 %v2120_v50  ;;  %v3598_v35 = vpack.c.bf16 %v3538_v33, %v3537_v34  ;;  %v6385_v50 = vld [vmem:[%s7478_s4 + $0x218] sm:$0xff]  }
 0x1e7   : > { %5816 = vmatprep.mubr.bf16.mxu1 %v3231_v36  ;;  %5845 = vmatpush3.bf16.msra.mxu1 %v6378_v44  ;;  %v3540_v44 = vld [vmem:[#allocation2 + $0x99] sm:$0xff] }
 0x1e8   : > { %5846 = vmatprep.subr.bf16.mxu1 %v6379_v46  ;;  %v3599_v51 = vpack.c.bf16 %v3540_v44, %v3539_v48  ;;  %5937 = vmatpush3.bf16.msra.mxu0 %v6392_v26 }
 0x1eb   : > { %5847 = vmatpush3.bf16.msra.mxu1 %v6379_v46  ;;  %v6386_v46 = vld [vmem:[%s7478_s4 + $0x220] sm:$0xff]  }
 0x1ec   : > { %5848 = vmatprep.subr.bf16.mxu1 %v6380_v37 }
 0x1ed   : > { %5673 = vmatmul.mubr.bf16.gmra.mrb[44].mxu0 %v3231_v36  ;;  %v3542_v36 = vld [vmem:[#allocation2 + $0xb1] sm:$0xff] }
 0x1ee   : > { %5817 = vmatmul.mubr.bf16.gmra.mrb[28].mxu1 %v3232_v58  ;;  %v3600_v55 = vpack.c.bf16 %v3542_v36, %v3541_v54  ;;  %v6387_v58 = vld [vmem:[%s7478_s4 + $0x228] sm:$0xff]  }
 0x1ef   : > { %5820 = vmatprep.mubr.bf16.mxu1 %v3233_v60  ;;  %5849 = vmatpush3.bf16.msra.mxu1 %v6380_v37  ;;  %v3544_v37 = vld [vmem:[#allocation2 + $0xc9] sm:$0xff]  ;;  %v3546_v60 = vld [vmem:[#allocation2 + $0xe1] sm:$0xff] }
 0x1f0   : > { %5850 = vmatprep.subr.bf16.mxu1 %v6381_v39  ;;  %v3601_v38 = vpack.c.bf16 %v3544_v37, %v3543_v56  ;;  %v3602_v40 = vpack.c.bf16 %v3546_v60, %v3545_v62  ;;  %v6395_v36 = vld [vmem:[%s7481_s7 + $0x28] sm:$0xff]  }
 0x1f3   : > { %5851 = vmatpush3.bf16.msra.mxu1 %v6381_v39  ;;  %v6388_v39 = vld [vmem:[%s7478_s4 + $0x230] sm:$0xff]  }
 0x1f4   : > { %5884 = vmatprep.subr.bf16.mxu1 %v6382_v61 }
 0x1f6   : > { %5821 = vmatmul.mubr.bf16.gmra.mrb[0].mxu1 %v3234_v6  ;;  %v6389_v6 = vld [vmem:[%s7478_s4 + $0x238] sm:$0xff]  }
 0x1f7   : > { %5824 = vmatprep.mubr.bf16.mxu1 %v3235_v10  ;;  %v3550_v10 = vld [vmem:[#allocation2 + $0x111] sm:$0xff] }
 0x1f8   : > { %v3604_v1 = vpack.c.bf16 %v3550_v10, %v3549_v4 }
 0x1fe   : > { %5825 = vmatmul.mubr.bf16.gmra.mrb[4].mxu1 %v3236_v28  ;;  %v3551_v28 = vld [vmem:[#allocation2 + $0x121] sm:$0xff] }
 0x1ff   : > { %5828 = vmatprep.mubr.bf16.mxu1 %v3237_v13  ;;  %v3605_v22 = vpack.c.bf16 %v3552_v43, %v3551_v28  ;;  %v3554_v13 = vld [vmem:[#allocation2 + $0x141] sm:$0xff]  ;;  %v7204_v43 = vld [vmem:[%s7479_s5] ss:$0 sm:$0xff] }
 0x200   : > { %v3606_v59 = vpack.c.bf16 %v3554_v13, %v3553_v2  ;;  %v7209_v28 = vld [vmem:[%s7480_s6] ss:$0 sm:$0xff] }
 0x206   : > { %5829 = vmatmul.mubr.bf16.gmra.mrb[8].mxu1 %v3238_v17  ;;  %v3555_v17 = vld [vmem:[#allocation2 + $0x151] sm:$0xff] }
 0x207   : > { %5832 = vmatprep.mubr.bf16.mxu1 %v3239_v31  ;;  %v3607_v24 = vpack.c.bf16 %v3556_v14, %v3555_v17  ;;  %v3558_v31 = vld [vmem:[#allocation2 + $0x171] sm:$0xff] }
 0x20e   : > { %5833 = vmatmul.mubr.bf16.gmra.mrb[12].mxu1 %v3240_v8  ;;  %v3557_v8 = vld [vmem:[#allocation2 + $0x169] sm:$0xff] }
 0x20f   : > { %5852 = vmatprep.mubr.bf16.mxu1 %v3595_v32  ;;  %v3608_v32 = vpack.c.bf16 %v3558_v31, %v3557_v8 }
 0x216   : > { %5853 = vmatmul.mubr.bf16.vlgmr.msra.gmra.mrb[16].mxu1 %v3596_v11  ;;  %v3562_v11 = vld [vmem:[#allocation2 + $0x1a1] sm:$0xff] }
 0x217   : > { %5885 = vmatpush3.bf16.msra.mxu1 %v6382_v61  ;;  %5856 = vmatprep.mubr.bf16.mxu1 %v3597_v29  ;;  %v3548_v61 = vld [vmem:[#allocation2 + $0xf9] sm:$0xff] }
 0x218   : > { %5886 = vmatprep.subr.bf16.mxu1 %v6383_v27  ;;  %v3603_v7 = vpack.c.bf16 %v3548_v61, %v3547_v5  ;;  %v6393_v29 = vld [vmem:[%s7481_s7 + $0x18] sm:$0xff]  }
 0x219   : > { %5938 = vmatprep.subr.bf16.mxu0 %v6393_v29 }
 0x21a   : > { %5939 = vmatpush3.bf16.msra.mxu0 %v6393_v29 }
 0x21b   : > { %5887 = vmatpush3.bf16.msra.mxu1 %v6383_v27  ;;  %v3610_v27 = vpack.c.bf16 %v3562_v11, %v3561_v21 }
 0x21c   : > { %5888 = vmatprep.subr.bf16.mxu1 %v6384_v30 }
 0x21e   : > { %5857 = vmatmul.mubr.bf16.gmra.mrb[20].mxu1 %v3598_v35 }
 0x21f   : > { %5860 = vmatprep.mubr.bf16.mxu1 %v3599_v51  ;;  %5889 = vmatpush3.bf16.msra.mxu1 %v6384_v30  ;;  %v6394_v30 = vld [vmem:[%s7481_s7 + $0x20] sm:$0xff]  }
 0x220   : > { %5890 = vmatprep.subr.bf16.mxu1 %v6385_v50  ;;  %5940 = vmatprep.subr.bf16.mxu0 %v6394_v30 }
 0x221   : > { %5941 = vmatpush3.bf16.msra.mxu0 %v6394_v30 }
 0x222   : > { %5942 = vmatprep.subr.bf16.mxu0 %v6395_v36 }
 0x223   : > { %5891 = vmatpush3.bf16.msra.mxu1 %v6385_v50 }
 0x224   : > { %5892 = vmatprep.subr.bf16.mxu1 %v6386_v46 }
 0x225   : > { %5943 = vmatpush3.bf16.msra.mxu0 %v6395_v36 }
 0x226   : > { %5861 = vmatmul.mubr.bf16.gmra.mrb[24].mxu1 %v3600_v55 }
 0x227   : > { %5864 = vmatprep.mubr.bf16.mxu1 %v3601_v38  ;;  %5893 = vmatpush3.bf16.msra.mxu1 %v6386_v46  ;;  %v6397_v38 = vld [vmem:[%s7481_s7 + $0x38] sm:$0xff]  }
 0x228   : > { %5894 = vmatprep.subr.bf16.mxu1 %v6387_v58 }
 0x22b   : > { %5895 = vmatpush3.bf16.msra.mxu1 %v6387_v58  ;;  %v6396_v58 = vld [vmem:[%s7481_s7 + $0x30] sm:$0xff]  }
 0x22c   : > { %5896 = vmatprep.subr.bf16.mxu1 %v6388_v39  ;;  %5944 = vmatprep.subr.bf16.mxu0 %v6396_v58 }
 0x22d   : > { %5945 = vmatpush3.bf16.msra.mxu0 %v6396_v58 }
 0x22e   : > { %5865 = vmatmul.mubr.bf16.gmra.mrb[28].mxu1 %v3602_v40  ;;  %5946 = vmatprep.subr.bf16.mxu0 %v6397_v38 }
 0x22f   : > { %5868 = vmatprep.mubr.bf16.mxu1 %v3603_v7  ;;  %5897 = vmatpush3.bf16.msra.mxu1 %v6388_v39 }
 0x230   : > { %5898 = vmatprep.subr.bf16.mxu1 %v6389_v6 }
 0x231   : > { %5947 = vmatpush3.bf16.msra.mxu0 %v6397_v38 }
 0x233   : > { %5899 = vmatpush3.bf16.msra.mxu1 %v6389_v6 }
 0x236   : > { %5869 = vmatmul.mubr.bf16.gmra.mrb[0].mxu1 %v3604_v1 }
 0x237   : > { %5872 = vmatprep.mubr.bf16.mxu1 %v3605_v22 }
 0x23e   : > { %5873 = vmatmul.mubr.bf16.gmra.mrb[4].mxu1 %v3606_v59 }
 0x23f   : > { %5876 = vmatprep.mubr.bf16.mxu1 %v3607_v24 }
 0x246   : > { %5877 = vmatmul.mubr.bf16.gmra.mrb[8].mxu1 %v3608_v32 }
 0x247   : > { %5880 = vmatprep.mubr.bf16.mxu1 %v3609_v20 }
 0x24e   : > { %5881 = vmatmul.mubr.bf16.gmra.mrb[12].mxu1 %v3610_v27 }
 0x24f   : > { %5900 = vmatprep.mubr.bf16.mxu1 %v6979_v23  ;;  %v3931_v23 = vld [vmem:[#allocation2 + $0x19a] sm:$0xff] }
 0x256   : > { %5901 = vmatmul.mubr.bf16.vlgmr.msra.gmra.mrb[16].mxu1 %v6984_v25  ;;  %v3932_v25 = vld [vmem:[#allocation2 + $0x1a2] sm:$0xff] }
 0x257   : > { %5904 = vmatprep.mubr.bf16.mxu1 %v6994_v45 }
 0x25e   : > { %5905 = vmatmul.mubr.bf16.gmra.mrb[20].mxu1 %v7001_v47 }
 0x25f   : > { %5908 = vmatprep.mubr.bf16.mxu1 %v7012_v52 }
 0x266   : > { %5909 = vmatmul.mubr.bf16.gmra.mrb[24].mxu1 %v7019_v53  ;;  %v3980_v53 = vpack.c.bf16 %v3932_v25, %v3931_v23 }
 0x267   : > { %5912 = vmatprep.mubr.bf16.mxu1 %v7030_v57 }
 0x26e   : > { %5913 = vmatmul.mubr.bf16.gmra.mrb[28].mxu1 %v7037_v42 }
 0x26f   : > { %5916 = vmatprep.mubr.bf16.mxu1 %v7048_v0 }
 0x276   : > { %5917 = vmatmul.mubr.bf16.gmra.mrb[0].mxu1 %v7052_v3 }
 0x277   : > { %5920 = vmatprep.mubr.bf16.mxu1 %v7057_v9 }
 0x27e   : > { %5921 = vmatmul.mubr.bf16.gmra.mrb[4].mxu1 %v7060_v41 }
 0x27f   : > { %5924 = vmatprep.mubr.bf16.mxu1 %v7065_v12 }
 0x286   : > { %5925 = vmatmul.mubr.bf16.gmra.mrb[8].mxu1 %v7068_v19 }
 0x287   : > { %5928 = vmatprep.mubr.bf16.mxu1 %v7073_v16 }
 0x288   : > { %v7152_v45 = vpop.f32.mrb[48].mxu0 }
 0x289   : > { %v7154_v47 = vpop.f32.mrb[49].mxu0 }
 0x28a   : > { %v7156_v52 = vpop.f32.mrb[50].mxu0 }
 0x28b   : > { %v7158_v57 = vpop.f32.mrb[51].mxu0 }
 0x28e   : > { %5929 = vmatmul.mubr.bf16.gmra.mrb[12].mxu1 %v3980_v53 }
 0x290   : > { %v7160_v42 = vpop.f32.mrb[52].mxu0 }
 0x291   : > { %v7162_v0 = vpop.f32.mrb[53].mxu0 }
 0x292   : > { %v7164_v3 = vpop.f32.mrb[54].mxu0 }
 0x293   : > { %v7166_v9 = vpop.f32.mrb[55].mxu0 }
 0x298   : > { %v7168_v41 = vpop.f32.mrb[56].mxu0 }
 0x299   : > { %v7170_v12 = vpop.f32.mrb[57].mxu0 }
 0x29a   : > { %v7172_v19 = vpop.f32.mrb[58].mxu0 }
 0x29b   : > { %v7174_v16 = vpop.f32.mrb[59].mxu0 }
 0x2a0   : > { %v7176_v33 = vpop.f32.mrb[60].mxu0 }
 0x2a1   : > { %v7178_v44 = vpop.f32.mrb[61].mxu0 }
 0x2a2   : > { %v7180_v34 = vpop.f32.mrb[62].mxu0 }
 0x2a3   : > { %v7182_v35 = vpop.f32.mrb[63].mxu0 }
 0x2a8   : > { %v5662_v48 = vpop.f32.mrb[32].mxu0 }
 0x2a9   : > { %v2229_v50 = vpop.f32.mrb[33].mxu0 }
 0x2aa   : > { %v5663_v51 = vpop.f32.mrb[34].mxu0 }
 0x2ab   : > { %v2232_v46 = vpop.f32.mrb[35].mxu0 }
 0x2b0   : > { %v5666_v37 = vpop.f32.mrb[36].mxu0 }
 0x2b1   : > { %v2245_v54 = vpop.f32.mrb[37].mxu0 }
 0x2b2   : > { %v5667_v55 = vpop.f32.mrb[38].mxu0 }
 0x2b3   : > { %v2248_v56 = vpop.f32.mrb[39].mxu0 }
 0x2b8   : > { %v5670_v39 = vpop.f32.mrb[40].mxu0 }
 0x2b9   : > { %v2261_v60 = vpop.f32.mrb[41].mxu0 }
 0x2ba   : > { %v5671_v61 = vpop.f32.mrb[42].mxu0 }
 0x2bb   : > { %v2264_v62 = vpop.f32.mrb[43].mxu0 }
 0x2c0   : > { %v7193_v40 = vpop.f32.mrb[44].mxu0 }
 0x2c1   : > { %v7195_v5 = vpop.f32.mrb[45].mxu0 }
 0x2c2   : > { %v7197_v6 = vpop.f32.mrb[46].mxu0 }
 0x2c3   : > { %v7199_v7 = vpop.f32.mrb[47].mxu0 }
 0x329   : > { %v5902_v10 = vpop.f32.mrb[16].mxu1 }
 0x32a   : > { %v5996_v4 = vadd.f32 %v5902_v10, %v5662_v48  ;;  %v4080_v1 = vpop.f32.mrb[17].mxu1 }
 0x32b   : > { %v5997_v22 = vadd.f32 %v4080_v1, %v2229_v50  ;;  %v5903_v13 = vpop.f32.mrb[18].mxu1 }
 0x32c   : > { %v4312_v14 = vmul.f32 %v5996_v4, %v7204_v43  ;;  %v5998_v2 = vadd.f32 %v5903_v13, %v5663_v51  ;;  %v4083_v59 = vpop.f32.mrb[19].mxu1 }
 0x32d   : > { %v4310_v17 = vmul.f32 %v5997_v22, %v7204_v43  ;;  %v5999_v24 = vadd.f32 %v4083_v59, %v2232_v46 }
 0x32e   : > { %v4351_v31 = vadd.f32 %v7209_v28, %v4312_v14  ;;  %v4313_v63 = vmul.f32 %v5998_v2, %v7204_v43 }
 0x32f   : > { %v4349_v8 = vadd.f32 %v7209_v28, %v4310_v17  ;;  %v4311_v18 = vmul.f32 %v5999_v24, %v7204_v43 }
 0x330   : > { %v4352_v49 = vadd.f32 %v7209_v28, %v4313_v63  ;;  %v4383_v20 = vmax.f32 %v4351_v31, 0.0 }
 0x331   : > { %v4350_v32 = vadd.f32 %v7209_v28, %v4311_v18  ;;  %v5906_v15 = vpop.f32.mrb[20].mxu1  ;;  %v4381_v27 = vmax.f32 %v4349_v8, 0.0 }
 0x332   : > { %v4384_v21 = vmax.f32 %v4352_v49, 0.0  ;;  %v6000_v11 = vadd.f32 %v5906_v15, %v5666_v37  ;;  %v4096_v26 = vpop.f32.mrb[21].mxu1 }
 0x333   : > { %v4382_v29 = vmax.f32 %v4350_v32, 0.0  ;;  %v6001_v30 = vadd.f32 %v4096_v26, %v2245_v54  ;;  %v5907_v23 = vpop.f32.mrb[22].mxu1 }
 0x334   : > { %v4414_v25 = vpack.c.bf16 %v4384_v21, %v4383_v20  ;;  %v4316_v53 = vmul.f32 %v6000_v11, %v7204_v43  ;;  %v6002_v48 = vadd.f32 %v5907_v23, %v5667_v55  ;;  %v4099_v50 = vpop.f32.mrb[23].mxu1 }
 0x335   : > { %v4314_v51 = vmul.f32 %v6001_v30, %v7204_v43  ;;  %v6003_v46 = vadd.f32 %v4099_v50, %v2248_v56  ;;  %v4413_v36 = vpack.c.bf16 %v4382_v29, %v4381_v27 }
 0x336   : > { %v4355_v58 = vadd.f32 %v7209_v28, %v4316_v53  ;;  %v4317_v38 = vmul.f32 %v6002_v48, %v7204_v43 }
 0x337   : > { %v4353_v37 = vadd.f32 %v7209_v28, %v4314_v51  ;;  %v4315_v10 = vmul.f32 %v6003_v46, %v7204_v43  ;;  %5948 = vmatprep.mubr.bf16.mxu0 %v4413_v36 }
 0x338   : > { %v4356_v54 = vadd.f32 %v7209_v28, %v4317_v38  ;;  %5949 = vmatmul.mubr.bf16.vlgmr.msra.gmra.mrb[64].mxu0 %v4414_v25  ;;  %v4387_v1 = vmax.f32 %v4355_v58, 0.0 }
 0x339   : > { %v4354_v4 = vadd.f32 %v7209_v28, %v4315_v10  ;;  %v5910_v55 = vpop.f32.mrb[24].mxu1  ;;  %v4385_v14 = vmax.f32 %v4353_v37, 0.0 }
 0x33a   : > { %v4388_v22 = vmax.f32 %v4356_v54, 0.0  ;;  %v6004_v13 = vadd.f32 %v5910_v55, %v5670_v39  ;;  %v4112_v56 = vpop.f32.mrb[25].mxu1 }
 0x33b   : > { %v4386_v2 = vmax.f32 %v4354_v4, 0.0  ;;  %v6005_v59 = vadd.f32 %v4112_v56, %v2261_v60  ;;  %v5911_v17 = vpop.f32.mrb[26].mxu1 }
 0x33c   : > { %v4320_v24 = vmul.f32 %v6004_v13, %v7204_v43  ;;  %v6006_v31 = vadd.f32 %v5911_v17, %v5671_v61  ;;  %v4115_v63 = vpop.f32.mrb[27].mxu1  ;;  %v4416_v8 = vpack.c.bf16 %v4388_v22, %v4387_v1 }
 0x33d   : > { %v4318_v18 = vmul.f32 %v6005_v59, %v7204_v43  ;;  %v6007_v49 = vadd.f32 %v4115_v63, %v2264_v62  ;;  %v4415_v32 = vpack.c.bf16 %v4386_v2, %v4385_v14 }
 0x33e   : > { %v4359_v15 = vadd.f32 %v7209_v28, %v4320_v24  ;;  %v4321_v20 = vmul.f32 %v6006_v31, %v7204_v43 }
 0x33f   : > { %v4357_v39 = vadd.f32 %v7209_v28, %v4318_v18  ;;  %v4319_v21 = vmul.f32 %v6007_v49, %v7204_v43  ;;  %5952 = vmatprep.mubr.bf16.mxu0 %v4415_v32 }
 0x340   : > { %v4360_v60 = vadd.f32 %v7209_v28, %v4321_v20  ;;  %5953 = vmatmul.mubr.bf16.gmra.mrb[68].mxu0 %v4416_v8  ;;  %v4391_v26 = vmax.f32 %v4359_v15, 0.0 }
 0x341   : > { %v4358_v61 = vadd.f32 %v7209_v28, %v4319_v21  ;;  %v5914_v11 = vpop.f32.mrb[28].mxu1  ;;  %v4389_v30 = vmax.f32 %v4357_v39, 0.0 }
 0x342   : > { %v4392_v27 = vmax.f32 %v4360_v60, 0.0  ;;  %v6008_v62 = vadd.f32 %v5914_v11, %v7193_v40  ;;  %v4128_v29 = vpop.f32.mrb[29].mxu1 }
 0x343   : > { %v4390_v23 = vmax.f32 %v4358_v61, 0.0  ;;  %v6009_v25 = vadd.f32 %v4128_v29, %v7195_v5  ;;  %v5915_v53 = vpop.f32.mrb[30].mxu1 }
 0x344   : > { %v4324_v48 = vmul.f32 %v6008_v62, %v7204_v43  ;;  %v6010_v50 = vadd.f32 %v5915_v53, %v7197_v6  ;;  %v4131_v51 = vpop.f32.mrb[31].mxu1  ;;  %v4418_v46 = vpack.c.bf16 %v4392_v27, %v4391_v26 }
 0x345   : > { %v4322_v36 = vmul.f32 %v6009_v25, %v7204_v43  ;;  %v6011_v58 = vadd.f32 %v4131_v51, %v7199_v7  ;;  %v4417_v38 = vpack.c.bf16 %v4390_v23, %v4389_v30 }
 0x346   : > { %v4363_v37 = vadd.f32 %v7209_v28, %v4324_v48  ;;  %v4325_v40 = vmul.f32 %v6010_v50, %v7204_v43 }
 0x347   : > { %v4361_v10 = vadd.f32 %v7209_v28, %v4322_v36  ;;  %v4323_v5 = vmul.f32 %v6011_v58, %v7204_v43  ;;  %5956 = vmatprep.mubr.bf16.mxu0 %v4417_v38 }
 0x348   : > { %v4364_v54 = vadd.f32 %v7209_v28, %v4325_v40  ;;  %5957 = vmatmul.mubr.bf16.gmra.mrb[72].mxu0 %v4418_v46  ;;  %v4395_v55 = vmax.f32 %v4363_v37, 0.0 }
 0x349   : > { %v4362_v6 = vadd.f32 %v7209_v28, %v4323_v5  ;;  %v5918_v4 = vpop.f32.mrb[0].mxu1  ;;  %v4393_v13 = vmax.f32 %v4361_v10, 0.0 }
 0x34a   : > { %v4396_v1 = vmax.f32 %v4364_v54, 0.0  ;;  %v6012_v7 = vadd.f32 %v5918_v4, %v7152_v45  ;;  %v4144_v22 = vpop.f32.mrb[1].mxu1 }
 0x34b   : > { %v4394_v56 = vmax.f32 %v4362_v6, 0.0  ;;  %v6013_v14 = vadd.f32 %v4144_v22, %v7154_v47  ;;  %v5919_v2 = vpop.f32.mrb[2].mxu1 }
 0x34c   : > { %v4328_v59 = vmul.f32 %v6012_v7, %v7204_v43  ;;  %v6014_v17 = vadd.f32 %v5919_v2, %v7156_v52  ;;  %v4147_v24 = vpop.f32.mrb[3].mxu1  ;;  %v4420_v31 = vpack.c.bf16 %v4396_v1, %v4395_v55 }
 0x34d   : > { %v4326_v63 = vmul.f32 %v6013_v14, %v7204_v43  ;;  %v6015_v8 = vadd.f32 %v4147_v24, %v7158_v57  ;;  %v4419_v18 = vpack.c.bf16 %v4394_v56, %v4393_v13 }
 0x34e   : > { %v4367_v49 = vadd.f32 %v7209_v28, %v4328_v59  ;;  %v4329_v45 = vmul.f32 %v6014_v17, %v7204_v43 }
 0x34f   : > { %v4365_v32 = vadd.f32 %v7209_v28, %v4326_v63  ;;  %v4327_v47 = vmul.f32 %v6015_v8, %v7204_v43  ;;  %5960 = vmatprep.mubr.bf16.mxu0 %v4419_v18 }
 0x350   : > { %v4368_v15 = vadd.f32 %v7209_v28, %v4329_v45  ;;  %5961 = vmatmul.mubr.bf16.gmra.mrb[76].mxu0 %v4420_v31  ;;  %v4399_v39 = vmax.f32 %v4367_v49, 0.0 }
 0x351   : > { %v4366_v52 = vadd.f32 %v7209_v28, %v4327_v47  ;;  %v5922_v20 = vpop.f32.mrb[4].mxu1  ;;  %v4397_v61 = vmax.f32 %v4365_v32, 0.0 }
 0x352   : > { %v4400_v21 = vmax.f32 %v4368_v15, 0.0  ;;  %v6016_v57 = vadd.f32 %v5922_v20, %v7160_v42  ;;  %v4160_v60 = vpop.f32.mrb[5].mxu1 }
 0x353   : > { %v4398_v11 = vmax.f32 %v4366_v52, 0.0  ;;  %v6017_v26 = vadd.f32 %v4160_v60, %v7162_v0  ;;  %v5923_v27 = vpop.f32.mrb[6].mxu1 }
 0x354   : > { %v4332_v62 = vmul.f32 %v6016_v57, %v7204_v43  ;;  %v6018_v29 = vadd.f32 %v5923_v27, %v7164_v3  ;;  %v4163_v30 = vpop.f32.mrb[7].mxu1  ;;  %v4422_v23 = vpack.c.bf16 %v4400_v21, %v4399_v39 }
 0x355   : > { %v4330_v25 = vmul.f32 %v6017_v26, %v7204_v43  ;;  %v6019_v53 = vadd.f32 %v4163_v30, %v7166_v9  ;;  %v4421_v48 = vpack.c.bf16 %v4398_v11, %v4397_v61  ;;  %v6415_v30 = vld [vmem:[%s6617_s21 + $0x8] sm:$0xff]  }
 0x356   : > { %v4371_v50 = vadd.f32 %v7209_v28, %v4332_v62  ;;  %v4333_v42 = vmul.f32 %v6018_v29, %v7204_v43 }
 0x357   : > { %v4369_v51 = vadd.f32 %v7209_v28, %v4330_v25  ;;  %v4331_v0 = vmul.f32 %v6019_v53, %v7204_v43  ;;  %5964 = vmatprep.mubr.bf16.mxu0 %v4421_v48  ;;  %v6416_v48 = vld [vmem:[%s6617_s21] sm:$0xff]  }
 0x358   : > { %v4372_v46 = vadd.f32 %v7209_v28, %v4333_v42  ;;  %5965 = vmatmul.mubr.bf16.gmra.mrb[80].mxu0 %v4422_v23  ;;  %v4403_v58 = vmax.f32 %v4371_v50, 0.0  ;;  %v4734_v23 = vunpack.c.l.bf16 %v6415_v30  ;;  %v4732_v50 = vunpack.c.l.bf16 %v6416_v48 }
 0x359   : > { %v4370_v3 = vadd.f32 %v7209_v28, %v4331_v0  ;;  %v5926_v36 = vpop.f32.mrb[8].mxu1  ;;  %v4401_v40 = vmax.f32 %v4369_v51, 0.0  ;;  %v4735_v0 = vunpack.c.h.bf16 %v6415_v30 }
 0x35a   : > { %v4404_v38 = vmax.f32 %v4372_v46, 0.0  ;;  %v6020_v9 = vadd.f32 %v5926_v36, %v7168_v41  ;;  %v4176_v37 = vpop.f32.mrb[9].mxu1 }
 0x35b   : > { %v4402_v10 = vmax.f32 %v4370_v3, 0.0  ;;  %v6021_v5 = vadd.f32 %v4176_v37, %v7170_v12  ;;  %v5927_v54 = vpop.f32.mrb[10].mxu1 }
 0x35c   : > { %v4336_v6 = vmul.f32 %v6020_v9, %v7204_v43  ;;  %v6022_v4 = vadd.f32 %v5927_v54, %v7172_v19  ;;  %v4179_v55 = vpop.f32.mrb[11].mxu1  ;;  %v4424_v1 = vpack.c.bf16 %v4404_v38, %v4403_v58  ;;  %v4733_v58 = vunpack.c.h.bf16 %v6416_v48 }
 0x35d   : > { %v4334_v7 = vmul.f32 %v6021_v5, %v7204_v43  ;;  %v6023_v22 = vadd.f32 %v4179_v55, %v7174_v16  ;;  %v4423_v13 = vpack.c.bf16 %v4402_v10, %v4401_v40 }
 0x35e   : > { %v4375_v56 = vadd.f32 %v7209_v28, %v4336_v6  ;;  %v4337_v41 = vmul.f32 %v6022_v4, %v7204_v43 }
 0x35f   : > { %v4373_v14 = vadd.f32 %v7209_v28, %v4334_v7  ;;  %v4335_v12 = vmul.f32 %v6023_v22, %v7204_v43  ;;  %5968 = vmatprep.mubr.bf16.mxu0 %v4423_v13  ;;  %v6417_v7 = vld [vmem:[%s6617_s21 + $0x18] sm:$0xff]  }
 0x360   : > { %v4376_v2 = vadd.f32 %v7209_v28, %v4337_v41  ;;  %5969 = vmatmul.mubr.bf16.gmra.mrb[84].mxu0 %v4424_v1  ;;  %v4407_v17 = vmax.f32 %v4375_v56, 0.0  ;;  %v4738_v22 = vunpack.c.l.bf16 %v6417_v7 }
 0x361   : > { %v4374_v19 = vadd.f32 %v7209_v28, %v4335_v12  ;;  %v5930_v59 = vpop.f32.mrb[12].mxu1  ;;  %v4405_v63 = vmax.f32 %v4373_v14, 0.0  ;;  %v6418_v14 = vld [vmem:[%s6617_s21 + $0x10] sm:$0xff]  }
 0x362   : > { %v4408_v24 = vmax.f32 %v4376_v2, 0.0  ;;  %v6024_v16 = vadd.f32 %v5930_v59, %v7176_v33  ;;  %v4192_v31 = vpop.f32.mrb[13].mxu1  ;;  %v4736_v12 = vunpack.c.l.bf16 %v6418_v14 }
 0x363   : > { %v4406_v8 = vmax.f32 %v4374_v19, 0.0  ;;  %v6025_v18 = vadd.f32 %v4192_v31, %v7178_v44  ;;  %v5931_v49 = vpop.f32.mrb[14].mxu1 }
 0x364   : > { %v4340_v45 = vmul.f32 %v6024_v16, %v7204_v43  ;;  %v6026_v32 = vadd.f32 %v5931_v49, %v7180_v34  ;;  %v4195_v47 = vpop.f32.mrb[15].mxu1  ;;  %v4426_v15 = vpack.c.bf16 %v4408_v24, %v4407_v17  ;;  %v4739_v17 = vunpack.c.h.bf16 %v6417_v7 }
 0x365   : > { %v4338_v52 = vmul.f32 %v6025_v18, %v7204_v43  ;;  %v6027_v20 = vadd.f32 %v4195_v47, %v7182_v35  ;;  %v4425_v39 = vpack.c.bf16 %v4406_v8, %v4405_v63  ;;  %v4737_v63 = vunpack.c.h.bf16 %v6418_v14 }
 0x366   : > { %v4379_v21 = vadd.f32 %v7209_v28, %v4340_v45  ;;  %v4341_v33 = vmul.f32 %v6026_v32, %v7204_v43 }
 0x367   : > { %v4377_v57 = vadd.f32 %v7209_v28, %v4338_v52  ;;  %v4339_v44 = vmul.f32 %v6027_v20, %v7204_v43  ;;  %5972 = vmatprep.mubr.bf16.mxu0 %v4425_v39  ;;  %v7298_v43 = vld [vmem:[%s7482_s8] ss:$0 sm:$0xff] }
 0x368   : > { %v4380_v34 = vadd.f32 %v7209_v28, %v4341_v33  ;;  %5973 = vmatmul.mubr.bf16.gmra.mrb[88].mxu0 %v4426_v15  ;;  %v4411_v61 = vmax.f32 %v4379_v21, 0.0  ;;  %v6419_v33 = vld [vmem:[%s6617_s21 + $0x28] sm:$0xff]  }
 0x369   : > { %v4378_v60 = vadd.f32 %v7209_v28, %v4339_v44  ;;  %v4409_v11 = vmax.f32 %v4377_v57, 0.0  ;;  %v7304_v28 = vld [vmem:[%s7483_s9] ss:$0 sm:$0xff]  ;;  %v4742_v57 = vunpack.c.l.bf16 %v6419_v33 }
 0x36a   : > { %v4412_v35 = vmax.f32 %v4380_v34, 0.0 }
 0x36b   : > { %v4410_v26 = vmax.f32 %v4378_v60, 0.0 }
 0x36c   : > { %v4428_v27 = vpack.c.bf16 %v4412_v35, %v4411_v61  ;;  %v6420_v61 = vld [vmem:[%s6617_s21 + $0x20] sm:$0xff]  }
 0x36d   : > { %v4427_v62 = vpack.c.bf16 %v4410_v26, %v4409_v11  ;;  %v4740_v35 = vunpack.c.l.bf16 %v6420_v61 }
 0x36f   : > { %5976 = vmatprep.mubr.bf16.mxu0 %v4427_v62  ;;  %v4743_v62 = vunpack.c.h.bf16 %v6419_v33 }
 0x370   : > { %5977 = vmatmul.mubr.bf16.gmra.mrb[92].mxu0 %v4428_v27 }
 0x40b   : > { %v5950_v29 = vpop.f32.mrb[64].mxu0 }
 0x40c   : > { %v4663_v25 = vmul.f32 %v5950_v29, %v7298_v43  ;;  %v4527_v53 = vpop.f32.mrb[65].mxu0 }
 0x40d   : > { %v4661_v42 = vmul.f32 %v7298_v43, %v4527_v53  ;;  %v5951_v51 = vpop.f32.mrb[66].mxu0 }
 0x40e   : > { %v4702_v46 = vadd.f32 %v7304_v28, %v4663_v25  ;;  %v4664_v3 = vmul.f32 %v5951_v51, %v7298_v43  ;;  %v4530_v36 = vpop.f32.mrb[67].mxu0  ;;  %v4741_v25 = vunpack.c.h.bf16 %v6420_v61 }
 0x40f   : > { %v4700_v38 = vadd.f32 %v7304_v28, %v4661_v42  ;;  %v4662_v9 = vmul.f32 %v7298_v43, %v4530_v36 }
 0x410   : > { %v4766_v37 = vadd.f32 %v4734_v23, %v4702_v46  ;;  %v4703_v40 = vadd.f32 %v7304_v28, %v4664_v3 }
 0x411   : > { %v4764_v10 = vadd.f32 %v4732_v50, %v4700_v38  ;;  %v4701_v5 = vadd.f32 %v7304_v28, %v4662_v9  ;;  %v6421_v9 = vld [vmem:[%s6617_s21 + $0x38] sm:$0xff]  }
 0x412   : > { %v4798_v54 = vmax.f32 %v4766_v37, 0.0  ;;  %v4767_v6 = vadd.f32 %v4735_v0, %v4703_v40  ;;  %v4746_v37 = vunpack.c.l.bf16 %v6421_v9  ;;  %v4747_v7 = vunpack.c.h.bf16 %v6421_v9 }
 0x413   : > { %v4796_v4 = vmax.f32 %v4764_v10, 0.0  ;;  %v4765_v55 = vadd.f32 %v4733_v58, %v4701_v5  ;;  %v5954_v1 = vpop.f32.mrb[68].mxu0 }
 0x414   : > { %4830 = vst [vmem:[%s7319_s29 + $0x10] sm:$0xff] %v4798_v54  ;;  %v4799_v13 = vmax.f32 %v4767_v6, 0.0  ;;  %v4667_v56 = vmul.f32 %v5954_v1, %v7298_v43  ;;  %v4543_v41 = vpop.f32.mrb[69].mxu0  ;;  %v6422_v54 = vld [vmem:[%s6617_s21 + $0x30] sm:$0xff]  }
 0x415   : > { %4828 = vst [vmem:[%s7319_s29] sm:$0xff] %v4796_v4  ;;  %v4797_v2 = vmax.f32 %v4765_v55, 0.0  ;;  %v4665_v19 = vmul.f32 %v7298_v43, %v4543_v41  ;;  %v5955_v59 = vpop.f32.mrb[70].mxu0  ;;  %v4744_v6 = vunpack.c.l.bf16 %v6422_v54  ;;  %v4745_v41 = vunpack.c.h.bf16 %v6422_v54 }
 0x416   : > { %4831 = vst [vmem:[%s7319_s29 + $0x18] sm:$0xff] %v4799_v13  ;;  %v4706_v24 = vadd.f32 %v7304_v28, %v4667_v56  ;;  %v4668_v16 = vmul.f32 %v5955_v59, %v7298_v43  ;;  %v4546_v31 = vpop.f32.mrb[71].mxu0 }
 0x417   : > { %4829 = vst [vmem:[%s7319_s29 + $0x8] sm:$0xff] %v4797_v2  ;;  %v4704_v8 = vadd.f32 %v7304_v28, %v4665_v19  ;;  %v4666_v18 = vmul.f32 %v7298_v43, %v4546_v31 }
 0x418   : > { %v4770_v49 = vadd.f32 %v4738_v22, %v4706_v24  ;;  %v4707_v45 = vadd.f32 %v7304_v28, %v4668_v16 }
 0x419   : > { %v4768_v32 = vadd.f32 %v4736_v12, %v4704_v8  ;;  %v4705_v47 = vadd.f32 %v7304_v28, %v4666_v18  ;;  %v6423_v18 = vld [vmem:[%s6617_s21 + $0x48] sm:$0xff]  }
 0x41a   : > { %v4802_v15 = vmax.f32 %v4770_v49, 0.0  ;;  %v4771_v52 = vadd.f32 %v4739_v17, %v4707_v45  ;;  %v4750_v49 = vunpack.c.l.bf16 %v6423_v18  ;;  %v4751_v33 = vunpack.c.h.bf16 %v6423_v18 }
 0x41b   : > { %v4800_v20 = vmax.f32 %v4768_v32, 0.0  ;;  %v4769_v39 = vadd.f32 %v4737_v63, %v4705_v47  ;;  %v5958_v21 = vpop.f32.mrb[72].mxu0 }
 0x41c   : > { %4834 = vst [vmem:[%s7319_s29 + $0x30] sm:$0xff] %v4802_v15  ;;  %v4803_v44 = vmax.f32 %v4771_v52, 0.0  ;;  %v4671_v34 = vmul.f32 %v5958_v21, %v7298_v43  ;;  %v4559_v60 = vpop.f32.mrb[73].mxu0  ;;  %v6424_v15 = vld [vmem:[%s6617_s21 + $0x40] sm:$0xff]  }
 0x41d   : > { %4832 = vst [vmem:[%s7319_s29 + $0x20] sm:$0xff] %v4800_v20  ;;  %v4801_v11 = vmax.f32 %v4769_v39, 0.0  ;;  %v4669_v26 = vmul.f32 %v7298_v43, %v4559_v60  ;;  %v5959_v27 = vpop.f32.mrb[74].mxu0  ;;  %v4748_v52 = vunpack.c.l.bf16 %v6424_v15  ;;  %v4749_v60 = vunpack.c.h.bf16 %v6424_v15 }
 0x41e   : > { %4835 = vst [vmem:[%s7319_s29 + $0x38] sm:$0xff] %v4803_v44  ;;  %v4710_v29 = vadd.f32 %v7304_v28, %v4671_v34  ;;  %v4672_v30 = vmul.f32 %v5959_v27, %v7298_v43  ;;  %v4562_v23 = vpop.f32.mrb[75].mxu0 }
 0x41f   : > { %4833 = vst [vmem:[%s7319_s29 + $0x28] sm:$0xff] %v4801_v11  ;;  %v4708_v53 = vadd.f32 %v7304_v28, %v4669_v26  ;;  %v4670_v48 = vmul.f32 %v7298_v43, %v4562_v23 }
 0x420   : > { %v4774_v50 = vadd.f32 %v4742_v57, %v4710_v29  ;;  %v4711_v42 = vadd.f32 %v7304_v28, %v4672_v30 }
 0x421   : > { %v4772_v51 = vadd.f32 %v4740_v35, %v4708_v53  ;;  %v4709_v0 = vadd.f32 %v7304_v28, %v4670_v48  ;;  %v6425_v48 = vld [vmem:[%s6617_s21 + $0x58] sm:$0xff]  }
 0x422   : > { %v4806_v46 = vmax.f32 %v4774_v50, 0.0  ;;  %v4775_v3 = vadd.f32 %v4743_v62, %v4711_v42  ;;  %v4754_v50 = vunpack.c.l.bf16 %v6425_v48  ;;  %v4755_v9 = vunpack.c.h.bf16 %v6425_v48 }
 0x423   : > { %v4804_v36 = vmax.f32 %v4772_v51, 0.0  ;;  %v4773_v58 = vadd.f32 %v4741_v25, %v4709_v0  ;;  %v5962_v38 = vpop.f32.mrb[76].mxu0 }
 0x424   : > { %4838 = vst [vmem:[%s7319_s29 + $0x50] sm:$0xff] %v4806_v46  ;;  %v4807_v40 = vmax.f32 %v4775_v3, 0.0  ;;  %v4675_v10 = vmul.f32 %v5962_v38, %v7298_v43  ;;  %v4575_v5 = vpop.f32.mrb[77].mxu0  ;;  %v6426_v46 = vld [vmem:[%s6617_s21 + $0x50] sm:$0xff]  }
 0x425   : > { %4836 = vst [vmem:[%s7319_s29 + $0x40] sm:$0xff] %v4804_v36  ;;  %v4805_v4 = vmax.f32 %v4773_v58, 0.0  ;;  %v4673_v55 = vmul.f32 %v7298_v43, %v4575_v5  ;;  %v5963_v1 = vpop.f32.mrb[78].mxu0  ;;  %v4752_v3 = vunpack.c.l.bf16 %v6426_v46  ;;  %v4753_v5 = vunpack.c.h.bf16 %v6426_v46 }
 0x426   : > { %4839 = vst [vmem:[%s7319_s29 + $0x58] sm:$0xff] %v4807_v40  ;;  %v4714_v22 = vadd.f32 %v7304_v28, %v4675_v10  ;;  %v4676_v13 = vmul.f32 %v5963_v1, %v7298_v43  ;;  %v4578_v56 = vpop.f32.mrb[79].mxu0 }
 0x427   : > { %4837 = vst [vmem:[%s7319_s29 + $0x48] sm:$0xff] %v4805_v4  ;;  %v4712_v14 = vadd.f32 %v7304_v28, %v4673_v55  ;;  %v4674_v12 = vmul.f32 %v7298_v43, %v4578_v56 }
 0x428   : > { %v4778_v2 = vadd.f32 %v4746_v37, %v4714_v22  ;;  %v4715_v19 = vadd.f32 %v7304_v28, %v4676_v13 }
 0x429   : > { %v4776_v59 = vadd.f32 %v4744_v6, %v4712_v14  ;;  %v4713_v17 = vadd.f32 %v7304_v28, %v4674_v12  ;;  %v6427_v12 = vld [vmem:[%s6617_s21 + $0x68] sm:$0xff]  }
 0x42a   : > { %v4810_v24 = vmax.f32 %v4778_v2, 0.0  ;;  %v4779_v16 = vadd.f32 %v4747_v7, %v4715_v19  ;;  %v4758_v2 = vunpack.c.l.bf16 %v6427_v12  ;;  %v4759_v18 = vunpack.c.h.bf16 %v6427_v12 }
 0x42b   : > { %v4808_v31 = vmax.f32 %v4776_v59, 0.0  ;;  %v4777_v63 = vadd.f32 %v4745_v41, %v4713_v17  ;;  %v5966_v8 = vpop.f32.mrb[80].mxu0 }
 0x42c   : > { %4842 = vst [vmem:[%s7319_s29 + $0x70] sm:$0xff] %v4810_v24  ;;  %v4811_v45 = vmax.f32 %v4779_v16, 0.0  ;;  %v4679_v32 = vmul.f32 %v5966_v8, %v7298_v43  ;;  %v4591_v47 = vpop.f32.mrb[81].mxu0  ;;  %v6428_v24 = vld [vmem:[%s6617_s21 + $0x60] sm:$0xff]  }
 0x42d   : > { %4840 = vst [vmem:[%s7319_s29 + $0x60] sm:$0xff] %v4808_v31  ;;  %v4809_v20 = vmax.f32 %v4777_v63, 0.0  ;;  %v4677_v39 = vmul.f32 %v7298_v43, %v4591_v47  ;;  %v5967_v21 = vpop.f32.mrb[82].mxu0  ;;  %v4756_v16 = vunpack.c.l.bf16 %v6428_v24  ;;  %v4757_v47 = vunpack.c.h.bf16 %v6428_v24 }
 0x42e   : > { %4843 = vst [vmem:[%s7319_s29 + $0x78] sm:$0xff] %v4811_v45  ;;  %v4718_v57 = vadd.f32 %v7304_v28, %v4679_v32  ;;  %v4680_v44 = vmul.f32 %v5967_v21, %v7298_v43  ;;  %v4594_v34 = vpop.f32.mrb[83].mxu0 }
 0x42f   : > { %4841 = vst [vmem:[%s7319_s29 + $0x68] sm:$0xff] %v4809_v20  ;;  %v4716_v61 = vadd.f32 %v7304_v28, %v4677_v39  ;;  %v4678_v35 = vmul.f32 %v7298_v43, %v4594_v34 }
 0x430   : > { %v4782_v11 = vadd.f32 %v4750_v49, %v4718_v57  ;;  %v4719_v26 = vadd.f32 %v7304_v28, %v4680_v44 }
 0x431   : > { %v4780_v27 = vadd.f32 %v4748_v52, %v4716_v61  ;;  %v4717_v62 = vadd.f32 %v7304_v28, %v4678_v35  ;;  %v6429_v35 = vld [vmem:[%s6617_s21 + $0x78] sm:$0xff]  }
 0x432   : > { %v4814_v29 = vmax.f32 %v4782_v11, 0.0  ;;  %v4783_v30 = vadd.f32 %v4751_v33, %v4719_v26  ;;  %v4762_v11 = vunpack.c.l.bf16 %v6429_v35  ;;  %v4763_v48 = vunpack.c.h.bf16 %v6429_v35 }
 0x433   : > { %v4812_v23 = vmax.f32 %v4780_v27, 0.0  ;;  %v4781_v25 = vadd.f32 %v4749_v60, %v4717_v62  ;;  %v5970_v53 = vpop.f32.mrb[84].mxu0 }
 0x434   : > { %4846 = vst [vmem:[%s7319_s29 + $0x90] sm:$0xff] %v4814_v29  ;;  %v4815_v42 = vmax.f32 %v4783_v30, 0.0  ;;  %v4683_v51 = vmul.f32 %v5970_v53, %v7298_v43  ;;  %v4607_v0 = vpop.f32.mrb[85].mxu0  ;;  %v6430_v29 = vld [vmem:[%s6617_s21 + $0x70] sm:$0xff]   ;;  %s5187_s21 = sshll.u32 %s6576_s17, 12  ;;  %s7433_s17 = scalar_lea.sflag [#allocation5], %s350_s25 }
 0x435   : > { %4844 = vst [vmem:[%s7319_s29 + $0x80] sm:$0xff] %v4812_v23  ;;  %v4813_v36 = vmax.f32 %v4781_v25, 0.0  ;;  %v4681_v58 = vmul.f32 %v7298_v43, %v4607_v0  ;;  %v5971_v38 = vpop.f32.mrb[86].mxu0  ;;  %v4760_v30 = vunpack.c.l.bf16 %v6430_v29  ;;  %v4761_v0 = vunpack.c.h.bf16 %v6430_v29  ;;  %s7424_s18 = scalar_lea.hbm %s7484_s10, %s5187_s21 }
 0x436   : > { %4847 = vst [vmem:[%s7319_s29 + $0x98] sm:$0xff] %v4815_v42  ;;  %v4722_v37 = vadd.f32 %v7304_v28, %v4683_v51  ;;  %v4684_v40 = vmul.f32 %v5971_v38, %v7298_v43  ;;  %v4610_v10 = vpop.f32.mrb[87].mxu0 }
 0x437   : > { %4845 = vst [vmem:[%s7319_s29 + $0x88] sm:$0xff] %v4813_v36  ;;  %v4720_v54 = vadd.f32 %v7304_v28, %v4681_v58  ;;  %v4682_v6 = vmul.f32 %v7298_v43, %v4610_v10 }
 0x438   : > { %v4786_v4 = vadd.f32 %v4754_v50, %v4722_v37  ;;  %v4723_v55 = vadd.f32 %v7304_v28, %v4684_v40 }
 0x439   : > { %v4784_v1 = vadd.f32 %v4752_v3, %v4720_v54  ;;  %v4721_v7 = vadd.f32 %v7304_v28, %v4682_v6 }
 0x43a   : > { %v4818_v22 = vmax.f32 %v4786_v4, 0.0  ;;  %v4787_v13 = vadd.f32 %v4755_v9, %v4723_v55 }
 0x43b   : > { %v4816_v56 = vmax.f32 %v4784_v1, 0.0  ;;  %v4785_v41 = vadd.f32 %v4753_v5, %v4721_v7  ;;  %v5974_v14 = vpop.f32.mrb[88].mxu0 }
 0x43c   : > { %4850 = vst [vmem:[%s7319_s29 + $0xb0] sm:$0xff] %v4818_v22  ;;  %v4819_v19 = vmax.f32 %v4787_v13, 0.0  ;;  %v4687_v59 = vmul.f32 %v5974_v14, %v7298_v43  ;;  %v4623_v17 = vpop.f32.mrb[89].mxu0 }
 0x43d   : > { %4848 = vst [vmem:[%s7319_s29 + $0xa0] sm:$0xff] %v4816_v56  ;;  %v4817_v31 = vmax.f32 %v4785_v41, 0.0  ;;  %v4685_v63 = vmul.f32 %v7298_v43, %v4623_v17  ;;  %v5975_v8 = vpop.f32.mrb[90].mxu0 }
 0x43e   : > { %4851 = vst [vmem:[%s7319_s29 + $0xb8] sm:$0xff] %v4819_v19  ;;  %v4726_v49 = vadd.f32 %v7304_v28, %v4687_v59  ;;  %v4688_v45 = vmul.f32 %v5975_v8, %v7298_v43  ;;  %v4626_v32 = vpop.f32.mrb[91].mxu0 }
 0x43f   : > { %4849 = vst [vmem:[%s7319_s29 + $0xa8] sm:$0xff] %v4817_v31  ;;  %v4724_v15 = vadd.f32 %v7304_v28, %v4685_v63  ;;  %v4686_v52 = vmul.f32 %v7298_v43, %v4626_v32 }
 0x440   : > { %v4790_v20 = vadd.f32 %v4758_v2, %v4726_v49  ;;  %v4727_v39 = vadd.f32 %v7304_v28, %v4688_v45 }
 0x441   : > { %v4788_v21 = vadd.f32 %v4756_v16, %v4724_v15  ;;  %v4725_v33 = vadd.f32 %v7304_v28, %v4686_v52 }
 0x442   : > { %v4822_v57 = vmax.f32 %v4790_v20, 0.0  ;;  %v4791_v44 = vadd.f32 %v4759_v18, %v4727_v39 }
 0x443   : > { %v4820_v34 = vmax.f32 %v4788_v21, 0.0  ;;  %v4789_v60 = vadd.f32 %v4757_v47, %v4725_v33  ;;  %v5978_v61 = vpop.f32.mrb[92].mxu0 }
 0x444   : > { %4854 = vst [vmem:[%s7319_s29 + $0xd0] sm:$0xff] %v4822_v57  ;;  %v4823_v26 = vmax.f32 %v4791_v44, 0.0  ;;  %v4691_v27 = vmul.f32 %v5978_v61, %v7298_v43  ;;  %v4639_v62 = vpop.f32.mrb[93].mxu0 }
 0x445   : > { %4852 = vst [vmem:[%s7319_s29 + $0xc0] sm:$0xff] %v4820_v34  ;;  %v4821_v23 = vmax.f32 %v4789_v60, 0.0  ;;  %v4689_v25 = vmul.f32 %v7298_v43, %v4639_v62  ;;  %v5979_v53 = vpop.f32.mrb[94].mxu0 }
 0x446   : > { %4855 = vst [vmem:[%s7319_s29 + $0xd8] sm:$0xff] %v4823_v26  ;;  %v4730_v50 = vadd.f32 %v7304_v28, %v4691_v27  ;;  %v4692_v42 = vmul.f32 %v5979_v53, %v7298_v43  ;;  %v4642_v51 = vpop.f32.mrb[95].mxu0 }
 0x447   : > { %4853 = vst [vmem:[%s7319_s29 + $0xc8] sm:$0xff] %v4821_v23  ;;  %v4728_v46 = vadd.f32 %v7304_v28, %v4689_v25  ;;  %v4690_v3 = vmul.f32 %v7298_v43, %v4642_v51 }
 0x448   : > { %v4794_v36 = vadd.f32 %v4762_v11, %v4730_v50  ;;  %v4731_v58 = vadd.f32 %v7304_v28, %v4692_v42 }
 0x449   : > { %v4792_v38 = vadd.f32 %v4760_v30, %v4728_v46  ;;  %v4729_v9 = vadd.f32 %v7304_v28, %v4690_v3 }
 0x44a   : > { %v4826_v37 = vmax.f32 %v4794_v36, 0.0  ;;  %v4795_v40 = vadd.f32 %v4763_v48, %v4731_v58 }
 0x44b   : > { %v4824_v10 = vmax.f32 %v4792_v38, 0.0  ;;  %v4793_v5 = vadd.f32 %v4761_v0, %v4729_v9 }
 0x44c   : > { %4858 = vst [vmem:[%s7319_s29 + $0xf0] sm:$0xff] %v4826_v37  ;;  %v4827_v54 = vmax.f32 %v4795_v40, 0.0 }
 0x44d   : > { %4856 = vst [vmem:[%s7319_s29 + $0xe0] sm:$0xff] %v4824_v10  ;;  %v4825_v43 = vmax.f32 %v4793_v5, 0.0 }
 0x44e   : > { %4859 = vst [vmem:[%s7319_s29 + $0xf8] sm:$0xff] %v4827_v54 }
 0x44f   : > { %4857 = vst [vmem:[%s7319_s29 + $0xe8] sm:$0xff] %v4825_v43 }
 0x450   : > { %6444 = shalt.err (!%p6441_p3)
}
 0x451   : > { %s6445_s25 = scalar_lea.hbm %s7424_s18, 4096  ;;  %s6449_s11 = scalar_lea.hbm %s7484_s10, 8192 }
 0x452   : > { %p6446_p4 = scmp.ne.s32.totalorder %s7424_s18, %s6445_s25  ;;  %p6450_p9 = scmp.lt.u32.totalorder %s7424_s18, %s7484_s10 }
 0x453   : > { %p6451_p10 = scmp.lt.u32.totalorder %s6449_s11, %s6445_s25  ;;  %p6453_p12 = scmp.lt.u32.totalorder %s6445_s25, %s7424_s18 }
 0x454   : > { %p6447_p7 = pnand %p6446_p4, %p6593_p5 }
 0x455   : > { %p6452_p11 = por %p6451_p10, %p6450_p9 }
 0x456   : > { %p6448_p8 = pneg %p6447_p7 }
 0x457   : > { %p6454_p13 = por %p6453_p12, %p6452_p11 }
 0x459   : > { %p6455_p0 = pnand %p6454_p13, %p6448_p8 }
 0x45b   : > { %6458 = shalt.err (!%p6455_p0)
}
 0x45c   : > { %s6498_s20 = smov 128   ;;  %s6499_s27 = smov 8  }
 0x45d   : > { %6252 = dma.vmem_to_hbm [thread:$0]  (%p6593_p5), %s7426_s30, 4096, %s7424_s18, %s7433_s17, %s6498_s20, %s6498_s20, %s6499_s27  }
 0x45e PF: > { %p6258_p1 = scmp.ge.s32.totalorder %s6493_s16, 2  ;;  %s4889_s28 = sand.u32 1, %s6481_s13  }
 0x45f   : > { %s4890_s25 = scalar_lea.sflag [#allocation5], %s4889_s28 }
 0x460   : > { %p6255_p2 = pnand %p6258_p1, %p6597_p6 }
 0x462   : > { %6476 = dma.done.wait (!%p6255_p2), %s4890_s25, 4096  }
 0x463   : > { %6478 = vsyncadd (!%p6255_p2), %s4890_s25, 4294963200  ;;  %p20_p3 = scmp.ge.s32.totalorder %s6580_s19, 4   ;;  %s7487_s13 = smov %s6485_s14 }
 0x464   : > { %s7488_s14 = smov %s6489_s15  ;;  %s7489_s15 = smov %s6591_s22 }
 0x465   : > { %s7490_s16 = smov %s6580_s19  ;;  %22 = sbr.rel (!%p20_p3) target bundleno = 3 (0x3), region = 105 }
 0x46c   :  { %4895 = vsyncpa [#allocation5], 1 }
 0x46d   :  { %4897 = vsyncpa [#allocation5 + $0x1], 1 }

</bundles_post_ra>
